<compile_context>
chip_gen: v5e
topology: v5e:2x2
jax: 0.10.0
libtpu: 0.0.40
codegen_flags: <defaults>
</compile_context>

<pallas_src>
from functools import partial

import numpy as np
import jax
import jax.numpy as jnp
from jax.experimental import pallas as pl
from jax.experimental.pallas import tpu as pltpu


# ---------------------------------------------------------------------------
# One-time weight preparation (hoisted out of the forward path).
#
# Layouts:
#   padded input  super-row t : lane = half*(W+2)*C + col_pad*C + ci
#   conv1 output  super-row m : lane = ro  * W   *F + col    *F + f
#   padded conv1  super-row t : lane = half*(W+2)*F + col_pad*F + f
#   final output  row h2      : lane =                w2     *F + f2
# where super-row t of a padded map holds padded rows {2t, 2t+1} and
# super-row m of an unpadded map holds rows {2m, 2m+1}.
# ---------------------------------------------------------------------------
def prepare_params(w1, b1, w2, b2, h):
    w1 = np.asarray(w1, np.float32)       # (F, C, 3, 3)  PyTorch OIHW
    b1 = np.asarray(b1, np.float32)       # (F,)
    w2 = np.asarray(w2, np.float32)       # (F, F, 4, 4)
    b2 = np.asarray(b2, np.float32)       # (F,)
    f, c = w1.shape[0], w1.shape[1]
    W, WP, H2 = h, h + 2, h // 2

    # conv1: out[2m+ro, wo, fo] = sum_{u,v,ci} x_pad[2m+ro+u, wo+v, ci] * w1[fo,ci,u,v]
    #   padded row 2m+ro+u lives in super-row m + (ro+u)//2, half (ro+u)%2.
    w1a = np.zeros((2 * WP * c, 2 * W * f), np.float32)     # reads super-row m
    w1b = np.zeros((2 * WP * c, 2 * W * f), np.float32)     # reads super-row m+1
    for ro in range(2):
        for u in range(3):
            s, half = divmod(ro + u, 2)
            dst = w1a if s == 0 else w1b
            for v in range(3):
                blk = w1[:, :, u, v].T                        # (C, F)
                for wo in range(W):
                    k0 = half * WP * c + (wo + v) * c
                    o0 = ro * W * f + wo * f
                    dst[k0:k0 + c, o0:o0 + f] += blk
    b1big = np.tile(b1, 2 * W)[None, :]                       # (1, 2*W*F)

    # conv2: out[h2o, w2o, f2] = sum_{p,q,f1} y1_pad[2*h2o+p, 2*w2o+q, f1] * w2[f2,f1,p,q]
    #   padded row 2*h2o+p lives in super-row h2o + p//2, half p%2.
    w2a = np.zeros((2 * WP * f, H2 * f), np.float32)          # reads super-row h2o
    w2b = np.zeros((2 * WP * f, H2 * f), np.float32)          # reads super-row h2o+1
    for p in range(4):
        s, half = divmod(p, 2)
        dst = w2a if s == 0 else w2b
        for q in range(4):
            blk = w2[:, :, p, q].T                            # (F_in, F_out)
            for wo in range(H2):
                k0 = half * WP * f + (2 * wo + q) * f
                o0 = wo * f
                dst[k0:k0 + f, o0:o0 + f] += blk
    b2big = np.tile(b2, H2)[None, :]                          # (1, H2*F)

    return tuple(jnp.asarray(a) for a in (w1a, w1b, b1big, w2a, w2b, b2big))


# ---------------------------------------------------------------------------
# Fused Pallas kernel: B images per grid step, everything stays in VMEM.
# ---------------------------------------------------------------------------
def _make_kernel(c, f, h):
    H2 = h // 2
    WC, WPC = h * c, (h + 2) * c
    WF, WPF = h * f, (h + 2) * f

    def kernel(x_ref, w1a_ref, w1b_ref, b1_ref, w2a_ref, w2b_ref, b2_ref,
               o_ref, xsp_ref, ysp_ref):
        bb = x_ref.shape[0]
        m = bb * H2

        # Zero-padded "super-row" scratches, re-zeroed every step (cheap; a
        # pl.when(program_id==0) one-shot init would miss the second core
        # under ("parallel",) megacore partitioning).
        xsp_ref[...] = jnp.zeros_like(xsp_ref)
        ysp_ref[...] = jnp.zeros_like(ysp_ref)

        # Scatter the (bb, H/2, 2*W*C) input block into the padded super-row
        # layout with two contiguous stores (no concats, no strided access):
        #   odd  image rows -> half 0 of super-rows 1..H2
        #   even image rows -> half 1 of super-rows 0..H2-1
        xsp_ref[:, 1:H2 + 1, c:c + WC] = x_ref[:, :, WC:2 * WC]
        xsp_ref[:, 0:H2, WPC + c:WPC + c + WC] = x_ref[:, :, 0:WC]

        # ---- conv1 (3x3, pad 1) + ReLU : two lane-dense matmuls -----------
        a0 = xsp_ref[:, 0:H2, :].reshape(m, 2 * WPC)
        a1 = xsp_ref[:, 1:H2 + 1, :].reshape(m, 2 * WPC)
        y1 = jnp.dot(a0, w1a_ref[...], preferred_element_type=jnp.float32)
        y1 = y1 + jnp.dot(a1, w1b_ref[...], preferred_element_type=jnp.float32)
        y1 = jnp.maximum(y1 + b1_ref[...], 0.0)              # (m, 2*W*F)
        y1 = y1.reshape(bb, H2, 2 * WF)

        # Scatter conv1 output into its padded super-row scratch (2 stores).
        ysp_ref[:, 1:H2 + 1, f:f + WF] = y1[:, :, WF:2 * WF]
        ysp_ref[:, 0:H2, WPF + f:WPF + f + WF] = y1[:, :, 0:WF]

        # ---- conv2 (4x4, stride 2, pad 1) + ReLU : two lane-dense matmuls -
        z0 = ysp_ref[:, 0:H2, :].reshape(m, 2 * WPF)
        z1 = ysp_ref[:, 1:H2 + 1, :].reshape(m, 2 * WPF)
        y2 = jnp.dot(z0, w2a_ref[...], preferred_element_type=jnp.float32)
        y2 = y2 + jnp.dot(z1, w2b_ref[...], preferred_element_type=jnp.float32)
        y2 = jnp.maximum(y2 + b2_ref[...], 0.0)              # (m, (W/2)*F)
        o_ref[...] = y2.reshape(bb, H2, H2 * f)              # 128-lane-dense store

    return kernel


# ---------------------------------------------------------------------------
# Forward wrapper.
# ---------------------------------------------------------------------------
@partial(jax.jit, static_argnames=("block_batch",))
def cnn_layer2_forward(x, params, *, block_batch=8):
    """x: (N, c, h, h) NCHW f32 -> (N, f, h//2, h//2) NCHW f32."""
    n, c, h, w = x.shape
    assert h == w and h % 2 == 0, "square input with even spatial size expected"
    h2 = h // 2
    w1a, w1b, b1big, w2a, w2b, b2big = params
    f = b2big.shape[1] // h2

    # Lane-dense "super-row" input: a pure reshape of NHWC (same bytes).
    x_sr = jnp.transpose(x, (0, 2, 3, 1)).astype(jnp.float32)
    x_sr = x_sr.reshape(n, h2, 2 * w * c)

    # Images per grid step: fold the batch into the matmul M dim, but keep a
    # few grid steps so both v7x TensorCores get work and DMA overlaps compute.
    bb = min(block_batch, max(1, n // 4))
    n_pad = pl.cdiv(n, bb) * bb
    if n_pad != n:
        x_sr = jnp.pad(x_sr, ((0, n_pad - n), (0, 0), (0, 0)))

    out = pl.pallas_call(
        _make_kernel(c, f, h),
        out_shape=jax.ShapeDtypeStruct((n_pad, h2, h2 * f), jnp.float32),
        grid_spec=pltpu.PrefetchScalarGridSpec(
            num_scalar_prefetch=0,
            grid=(n_pad // bb,),
            in_specs=[
                pl.BlockSpec((bb, h2, 2 * w * c), lambda i: (i, 0, 0)),
                pl.BlockSpec(w1a.shape, lambda i: (0, 0)),
                pl.BlockSpec(w1b.shape, lambda i: (0, 0)),
                pl.BlockSpec(b1big.shape, lambda i: (0, 0)),
                pl.BlockSpec(w2a.shape, lambda i: (0, 0)),
                pl.BlockSpec(w2b.shape, lambda i: (0, 0)),
                pl.BlockSpec(b2big.shape, lambda i: (0, 0)),
            ],
            out_specs=pl.BlockSpec((bb, h2, h2 * f), lambda i: (i, 0, 0)),
            scratch_shapes=[
                pltpu.VMEM((bb, h2 + 1, 2 * (w + 2) * c), jnp.float32),
                pltpu.VMEM((bb, h2 + 1, 2 * (w + 2) * f), jnp.float32),
            ],
        ),
        compiler_params=pltpu.CompilerParams(
            dimension_semantics=("parallel",)),
    )(x_sr, w1a, w1b, b1big, w2a, w2b, b2big)

    out = out[:n].reshape(n, h2, h2, f)          # (N, H/2, W/2, F)
    # TODO(synk): if the consumer accepts NHWC / flat (N, (H/2)*(W/2)*F), drop this
    # transpose — it is an extra HBM round trip on a microsecond kernel.
    return jnp.transpose(out, (0, 3, 1, 2))      # NCHW to match the PyTorch module


# ---------------------------------------------------------------------------
# Pure-JAX reference (lax convs) for correctness checking.
# ---------------------------------------------------------------------------
def cnn_layer2_reference(x, w1, b1, w2, b2):
    dn = ("NCHW", "OIHW", "NCHW")
    y = jax.lax.conv_general_dilated(
        x.astype(jnp.float32), w1, (1, 1), [(1, 1), (1, 1)],
        dimension_numbers=dn)
    y = jax.nn.relu(y + b1.reshape(1, -1, 1, 1))
    y = jax.lax.conv_general_dilated(
        y, w2, (2, 2), [(1, 1), (1, 1)], dimension_numbers=dn)
    return jax.nn.relu(y + b2.reshape(1, -1, 1, 1))


# ---------------------------------------------------------------------------
if __name__ == "__main__":
    N, C, H, F = 2, 4, 16, 16        # CNN_layer2(h=16, c=4, f=16), batch=2

    key = jax.random.PRNGKey(0)
    ks = jax.random.split(key, 5)
    scale = 0.1
    # nn.Conv2d(c, f, 3, padding=1): weight (f, c, 3, 3), bias (f,)
    w1 = scale * jax.random.normal(ks[0], (F, C, 3, 3), jnp.float32)
    b1 = scale * jax.random.normal(ks[1], (F,), jnp.float32)
    # nn.Conv2d(f, f, 4, stride=2, padding=1): weight (f, f, 4, 4), bias (f,)
    w2 = scale * jax.random.normal(ks[2], (F, F, 4, 4), jnp.float32)
    b2 = scale * jax.random.normal(ks[3], (F,), jnp.float32)

    x = jax.random.normal(ks[4], (N, C, H, H), jnp.float32)

    # Weight prep is done ONCE per weight set (hoisted out of the forward).
    params = prepare_params(w1, b1, w2, b2, H)

    out = jax.block_until_ready(cnn_layer2_forward(x, params))
    assert out.shape == (N, F, H // 2, H // 2), out.shape

    ref = jax.block_until_ready(cnn_layer2_reference(x, w1, b1, w2, b2))
    max_err = float(jnp.max(jnp.abs(out - ref)))
    assert jnp.allclose(out, ref, atol=1e-4, rtol=1e-4), max_err

    print("KERNEL_OK")
</pallas_src>

<mosaic_0001>
module attributes {stable_mosaic.version = 11 : i64} {
  func.func @kernel(%arg0: i32, %arg1: memref<1x8x128xf32, #tpu.memory_space<vmem>>, %arg2: memref<144x512xf32, #tpu.memory_space<vmem>>, %arg3: memref<144x512xf32, #tpu.memory_space<vmem>>, %arg4: memref<1x512xf32, #tpu.memory_space<vmem>>, %arg5: memref<576x128xf32, #tpu.memory_space<vmem>>, %arg6: memref<576x128xf32, #tpu.memory_space<vmem>>, %arg7: memref<1x128xf32, #tpu.memory_space<vmem>>, %arg8: memref<1x8x128xf32, #tpu.memory_space<vmem>>, %arg9: memref<1x9x144xf32, #tpu.memory_space<vmem>>, %arg10: memref<1x9x576xf32, #tpu.memory_space<vmem>>) attributes {dimension_semantics = [#tpu.dimension_semantics<parallel>], iteration_bounds = array<i64: 2>, scalar_prefetch = 0 : i64, scratch_operands = 2 : i64, tpu.core_type = #tpu.core_type<tc>, window_params = [{transform_indices = @transform_0, window_bounds = array<i64: 1, 8, 128>}, {pipeline_mode = #tpu.pipeline_mode<synchronous>, transform_indices = @transform_1, window_bounds = array<i64: 144, 512>}, {pipeline_mode = #tpu.pipeline_mode<synchronous>, transform_indices = @transform_2, window_bounds = array<i64: 144, 512>}, {pipeline_mode = #tpu.pipeline_mode<synchronous>, transform_indices = @transform_3, window_bounds = array<i64: 1, 512>}, {pipeline_mode = #tpu.pipeline_mode<synchronous>, transform_indices = @transform_4, window_bounds = array<i64: 576, 128>}, {pipeline_mode = #tpu.pipeline_mode<synchronous>, transform_indices = @transform_5, window_bounds = array<i64: 576, 128>}, {pipeline_mode = #tpu.pipeline_mode<synchronous>, transform_indices = @transform_6, window_bounds = array<i64: 1, 128>}, {transform_indices = @transform_7, window_bounds = array<i64: 1, 8, 128>}]} {
    %cst = arith.constant 0.000000e+00 : f32
    %0 = vector.broadcast %cst : f32 to vector<1x9x144xf32>
    %c0 = arith.constant 0 : index
    %c0_0 = arith.constant 0 : index
    %c0_1 = arith.constant 0 : index
    %1 = vector.load %arg9[%c0, %c0_0, %c0_1] : memref<1x9x144xf32, #tpu.memory_space<vmem>>, vector<1x9x144xf32>
    tpu.vector_store %arg9[%c0, %c0_0, %c0_1], %0 {strides = array<i32>} : memref<1x9x144xf32, #tpu.memory_space<vmem>>, vector<1x9x144xf32>,
    %cst_2 = arith.constant 0.000000e+00 : f32
    %2 = vector.broadcast %cst_2 : f32 to vector<1x9x576xf32>
    %c0_3 = arith.constant 0 : index
    %c0_4 = arith.constant 0 : index
    %c0_5 = arith.constant 0 : index
    %3 = vector.load %arg10[%c0_3, %c0_4, %c0_5] : memref<1x9x576xf32, #tpu.memory_space<vmem>>, vector<1x9x576xf32>
    tpu.vector_store %arg10[%c0_3, %c0_4, %c0_5], %2 {strides = array<i32>} : memref<1x9x576xf32, #tpu.memory_space<vmem>>, vector<1x9x576xf32>,
    %c0_6 = arith.constant 0 : index
    %c0_7 = arith.constant 0 : index
    %c64 = arith.constant 64 : index
    %4 = vector.load %arg1[%c0_6, %c0_7, %c64] : memref<1x8x128xf32, #tpu.memory_space<vmem>>, vector<1x8x64xf32>
    %c0_8 = arith.constant 0 : index
    %c1 = arith.constant 1 : index
    %c4 = arith.constant 4 : index
    %5 = vector.load %arg9[%c0_8, %c1, %c4] : memref<1x9x144xf32, #tpu.memory_space<vmem>>, vector<1x8x64xf32>
    tpu.vector_store %arg9[%c0_8, %c1, %c4], %4 {strides = array<i32>} : memref<1x9x144xf32, #tpu.memory_space<vmem>>, vector<1x8x64xf32>,
    %c0_9 = arith.constant 0 : index
    %c0_10 = arith.constant 0 : index
    %c0_11 = arith.constant 0 : index
    %6 = vector.load %arg1[%c0_9, %c0_10, %c0_11] : memref<1x8x128xf32, #tpu.memory_space<vmem>>, vector<1x8x64xf32>
    %c0_12 = arith.constant 0 : index
    %c0_13 = arith.constant 0 : index
    %c76 = arith.constant 76 : index
    %7 = vector.load %arg9[%c0_12, %c0_13, %c76] : memref<1x9x144xf32, #tpu.memory_space<vmem>>, vector<1x8x64xf32>
    tpu.vector_store %arg9[%c0_12, %c0_13, %c76], %6 {strides = array<i32>} : memref<1x9x144xf32, #tpu.memory_space<vmem>>, vector<1x8x64xf32>,
    %c0_14 = arith.constant 0 : index
    %c0_15 = arith.constant 0 : index
    %c0_16 = arith.constant 0 : index
    %8 = vector.load %arg9[%c0_14, %c0_15, %c0_16] : memref<1x9x144xf32, #tpu.memory_space<vmem>>, vector<1x8x144xf32>
    %9 = vector.shape_cast %8 : vector<1x8x144xf32> to vector<8x144xf32>
    %c0_17 = arith.constant 0 : index
    %c1_18 = arith.constant 1 : index
    %c0_19 = arith.constant 0 : index
    %10 = vector.load %arg9[%c0_17, %c1_18, %c0_19] : memref<1x9x144xf32, #tpu.memory_space<vmem>>, vector<1x8x144xf32>
    %11 = vector.shape_cast %10 : vector<1x8x144xf32> to vector<8x144xf32>
    %c0_20 = arith.constant 0 : index
    %c0_21 = arith.constant 0 : index
    %12 = vector.load %arg2[%c0_20, %c0_21] : memref<144x512xf32, #tpu.memory_space<vmem>>, vector<144x512xf32>
    %cst_22 = arith.constant dense<0.000000e+00> : vector<8x512xf32>
    %13 = tpu.matmul %9, %12, %cst_22 {dimension_numbers = #tpu.dot_dimension_numbers<[1], [0], [0], [1], [0, 0, 1, 1], [], []>} : vector<8x144xf32>, vector<144x512xf32>, vector<8x512xf32> -> vector<8x512xf32>
    %c0_23 = arith.constant 0 : index
    %c0_24 = arith.constant 0 : index
    %14 = vector.load %arg3[%c0_23, %c0_24] : memref<144x512xf32, #tpu.memory_space<vmem>>, vector<144x512xf32>
    %cst_25 = arith.constant dense<0.000000e+00> : vector<8x512xf32>
    %15 = tpu.matmul %11, %14, %cst_25 {dimension_numbers = #tpu.dot_dimension_numbers<[1], [0], [0], [1], [0, 0, 1, 1], [], []>} : vector<8x144xf32>, vector<144x512xf32>, vector<8x512xf32> -> vector<8x512xf32>
    %16 = arith.addf %13, %15 : vector<8x512xf32>
    %c0_26 = arith.constant 0 : index
    %c0_27 = arith.constant 0 : index
    %17 = vector.load %arg4[%c0_26, %c0_27] : memref<1x512xf32, #tpu.memory_space<vmem>>, vector<1x512xf32>
    %18 = vector.broadcast %17 : vector<1x512xf32> to vector<8x512xf32>
    %19 = arith.addf %16, %18 : vector<8x512xf32>
    %cst_28 = arith.constant 0.000000e+00 : f32
    %20 = vector.broadcast %cst_28 : f32 to vector<8x512xf32>
    %21 = arith.maximumf %19, %20 : vector<8x512xf32>
    %22 = vector.shape_cast %21 : vector<8x512xf32> to vector<1x8x512xf32>
    %23 = vector.extract_strided_slice %22 {offsets = [0, 0, 256], sizes = [1, 8, 256], strides = [1, 1, 1]} : vector<1x8x512xf32> to vector<1x8x256xf32>
    %c0_29 = arith.constant 0 : index
    %c1_30 = arith.constant 1 : index
    %c16 = arith.constant 16 : index
    %24 = vector.load %arg10[%c0_29, %c1_30, %c16] : memref<1x9x576xf32, #tpu.memory_space<vmem>>, vector<1x8x256xf32>
    tpu.vector_store %arg10[%c0_29, %c1_30, %c16], %23 {strides = array<i32>} : memref<1x9x576xf32, #tpu.memory_space<vmem>>, vector<1x8x256xf32>,
    %25 = vector.extract_strided_slice %22 {offsets = [0, 0, 0], sizes = [1, 8, 256], strides = [1, 1, 1]} : vector<1x8x512xf32> to vector<1x8x256xf32>
    %c0_31 = arith.constant 0 : index
    %c0_32 = arith.constant 0 : index
    %c304 = arith.constant 304 : index
    %26 = vector.load %arg10[%c0_31, %c0_32, %c304] : memref<1x9x576xf32, #tpu.memory_space<vmem>>, vector<1x8x256xf32>
    tpu.vector_store %arg10[%c0_31, %c0_32, %c304], %25 {strides = array<i32>} : memref<1x9x576xf32, #tpu.memory_space<vmem>>, vector<1x8x256xf32>,
    %c0_33 = arith.constant 0 : index
    %c0_34 = arith.constant 0 : index
    %c0_35 = arith.constant 0 : index
    %27 = vector.load %arg10[%c0_33, %c0_34, %c0_35] : memref<1x9x576xf32, #tpu.memory_space<vmem>>, vector<1x8x576xf32>
    %28 = vector.shape_cast %27 : vector<1x8x576xf32> to vector<8x576xf32>
    %c0_36 = arith.constant 0 : index
    %c1_37 = arith.constant 1 : index
    %c0_38 = arith.constant 0 : index
    %29 = vector.load %arg10[%c0_36, %c1_37, %c0_38] : memref<1x9x576xf32, #tpu.memory_space<vmem>>, vector<1x8x576xf32>
    %30 = vector.shape_cast %29 : vector<1x8x576xf32> to vector<8x576xf32>
    %c0_39 = arith.constant 0 : index
    %c0_40 = arith.constant 0 : index
    %31 = vector.load %arg5[%c0_39, %c0_40] : memref<576x128xf32, #tpu.memory_space<vmem>>, vector<576x128xf32>
    %cst_41 = arith.constant dense<0.000000e+00> : vector<8x128xf32>
    %32 = tpu.matmul %28, %31, %cst_41 {dimension_numbers = #tpu.dot_dimension_numbers<[1], [0], [0], [1], [0, 0, 1, 1], [], []>} : vector<8x576xf32>, vector<576x128xf32>, vector<8x128xf32> -> vector<8x128xf32>
    %c0_42 = arith.constant 0 : index
    %c0_43 = arith.constant 0 : index
    %33 = vector.load %arg6[%c0_42, %c0_43] : memref<576x128xf32, #tpu.memory_space<vmem>>, vector<576x128xf32>
    %cst_44 = arith.constant dense<0.000000e+00> : vector<8x128xf32>
    %34 = tpu.matmul %30, %33, %cst_44 {dimension_numbers = #tpu.dot_dimension_numbers<[1], [0], [0], [1], [0, 0, 1, 1], [], []>} : vector<8x576xf32>, vector<576x128xf32>, vector<8x128xf32> -> vector<8x128xf32>
    %35 = arith.addf %32, %34 : vector<8x128xf32>
    %c0_45 = arith.constant 0 : index
    %c0_46 = arith.constant 0 : index
    %36 = vector.load %arg7[%c0_45, %c0_46] : memref<1x128xf32, #tpu.memory_space<vmem>>, vector<1x128xf32>
    %37 = vector.broadcast %36 : vector<1x128xf32> to vector<8x128xf32>
    %38 = arith.addf %35, %37 : vector<8x128xf32>
    %cst_47 = arith.constant 0.000000e+00 : f32
    %39 = vector.broadcast %cst_47 : f32 to vector<8x128xf32>
    %40 = arith.maximumf %38, %39 : vector<8x128xf32>
    %41 = vector.shape_cast %40 : vector<8x128xf32> to vector<1x8x128xf32>
    %c0_48 = arith.constant 0 : index
    %c0_49 = arith.constant 0 : index
    %c0_50 = arith.constant 0 : index
    %42 = vector.load %arg8[%c0_48, %c0_49, %c0_50] : memref<1x8x128xf32, #tpu.memory_space<vmem>>, vector<1x8x128xf32>
    tpu.vector_store %arg8[%c0_48, %c0_49, %c0_50], %41 {strides = array<i32>} : memref<1x8x128xf32, #tpu.memory_space<vmem>>, vector<1x8x128xf32>,
    return
  }
  func.func @transform_0(%arg0: i32) -> (i32, i32, i32) {
    %c0_i32 = arith.constant 0 : i32
    %c0_i32_0 = arith.constant 0 : i32
    %c0_i32_1 = arith.constant 0 : i32
    return %arg0, %c0_i32, %c0_i32_0 : i32, i32, i32
  }
  func.func @transform_1(%arg0: i32) -> (i32, i32) {
    %c0_i32 = arith.constant 0 : i32
    %c0_i32_0 = arith.constant 0 : i32
    %c0_i32_1 = arith.constant 0 : i32
    return %c0_i32, %c0_i32_0 : i32, i32
  }
  func.func @transform_2(%arg0: i32) -> (i32, i32) {
    %c0_i32 = arith.constant 0 : i32
    %c0_i32_0 = arith.constant 0 : i32
    %c0_i32_1 = arith.constant 0 : i32
    return %c0_i32, %c0_i32_0 : i32, i32
  }
  func.func @transform_3(%arg0: i32) -> (i32, i32) {
    %c0_i32 = arith.constant 0 : i32
    %c0_i32_0 = arith.constant 0 : i32
    %c0_i32_1 = arith.constant 0 : i32
    return %c0_i32, %c0_i32_0 : i32, i32
  }
  func.func @transform_4(%arg0: i32) -> (i32, i32) {
    %c0_i32 = arith.constant 0 : i32
    %c0_i32_0 = arith.constant 0 : i32
    %c0_i32_1 = arith.constant 0 : i32
    return %c0_i32, %c0_i32_0 : i32, i32
  }
  func.func @transform_5(%arg0: i32) -> (i32, i32) {
    %c0_i32 = arith.constant 0 : i32
    %c0_i32_0 = arith.constant 0 : i32
    %c0_i32_1 = arith.constant 0 : i32
    return %c0_i32, %c0_i32_0 : i32, i32
  }
  func.func @transform_6(%arg0: i32) -> (i32, i32) {
    %c0_i32 = arith.constant 0 : i32
    %c0_i32_0 = arith.constant 0 : i32
    %c0_i32_1 = arith.constant 0 : i32
    return %c0_i32, %c0_i32_0 : i32, i32
  }
  func.func @transform_7(%arg0: i32) -> (i32, i32, i32) {
    %c0_i32 = arith.constant 0 : i32
    %c0_i32_0 = arith.constant 0 : i32
    %c0_i32_1 = arith.constant 0 : i32
    return %arg0, %c0_i32, %c0_i32_0 : i32, i32, i32
  }
}

</mosaic_0001>

<bundles_post_ra>
// kernel: cnn_layer2_forward.1
= control target key start
LH: loop header
LB: loop body
LE: loop exit
PB: predicated region body
PF: predicated region fallthrough
CT: control target
= control target key end

     0   :  { %12 = vsyncpa [#allocation5], 0  ;;  %s2088_s0 = inlined_call_operand.vmem [shape: f32[2,8,128], index: 0, kind: input, shape index: {}]   ;;  %s2089_s1 = inlined_call_operand.vmem [shape: f32[144,512], index: 1, kind: input, shape index: {}]   ;;  %s2090_s2 = inlined_call_operand.vmem [shape: f32[144,512], index: 2, kind: input, shape index: {}]   ;;  %s2091_s3 = inlined_call_operand.vmem [shape: f32[1,512], index: 3, kind: input, shape index: {}]   ;;  %s2092_s4 = inlined_call_operand.hbm [shape: f32[576,128], index: 4, kind: input, shape index: {}]   ;;  %s2093_s5 = inlined_call_operand.hbm [shape: f32[576,128], index: 5, kind: input, shape index: {}]   ;;  %s2094_s6 = inlined_call_operand.vmem [shape: f32[1,128], index: 6, kind: input, shape index: {}]   ;;  %s2095_s7 = inlined_call_operand.vmem [shape: f32[2,8,128], index: 7, kind: output, shape index: {}]  }
   0x1   :  { %13 = vsyncpa [#allocation7], 0  ;;  %s1546_s24 = smov 0  }
   0x2 LB: > { %s222_s27 = sshll.u32 %s2092_s4, 4  ;;  %s1361_s28 = sadd.s32 4294967295, %s1495_s24   ;;  %s1495_s24 = sphi %s1546_s24, %s19_s24   ;;  %s223_s27 = int_to_ptr.hbm [resolvable:$true] %s222_s27 }
   0x3   : > { %p1363_p0 = scmp.ge.s32.totalorder %s1495_s24, 1  ;;  %p202_p1 = scmp.lt.s32.totalorder %s1495_s24, 3 }
   0x4   : > { %p1399_p2 = scmp.eq.s32.totalorder %s1361_s28, 0  ;;  %s1497_s30 = smov [#allocation4]  }
   0x5   : > { %p1557_p3 = pnand %p1363_p0, %p202_p1  ;;  %s224_s8 = sshll.u32 %s1497_s30, 4  ;;  %s225_s8 = int_to_ptr.vmem [resolvable:$true] %s224_s8 }
   0x6   : > { %s236_s11 = sshll.u32 %s2093_s5, 4  ;;  %s1498_s12 = smov [#allocation6]   ;;  %s237_s11 = int_to_ptr.hbm [resolvable:$true] %s236_s11 }
   0x7   : > { %p1392_p4 = pneg %p1557_p3  ;;  %s238_s13 = sshll.u32 %s1498_s12, 4  ;;  %s239_s13 = int_to_ptr.vmem [resolvable:$true] %s238_s13 }
   0x8   : > { %s1499_s14 = smov 128   ;;  %s1500_s15 = smov 8  }
   0x9   : > { %p1393_p5 = pnand %p1399_p2, %p1392_p4  ;;  %264 = sbr.rel (%p1557_p3) target bundleno = 657 (0x291), region = 48 }
   0xb   : > { %1395 = dma.hbm_to_vmem [thread:$0]  (!%p1393_p5), %s223_s27, 9216, %s225_s8, [#allocation5], %s1499_s14, %s1499_s14, %s1500_s15  }
   0xc   : > { %1398 = dma.hbm_to_vmem [thread:$0]  (!%p1393_p5), %s237_s11, 9216, %s239_s13, [#allocation7], %s1499_s14, %s1499_s14, %s1500_s15  }
   0xe   : > { %1486 = dma.done.wait (%p1399_p2), [#allocation5], 9216  }
   0xf   : > { %1488 = vsyncadd (%p1399_p2), [#allocation5], 4294958080 }
  0x10   : > { %1490 = dma.done.wait (%p1399_p2), [#allocation7], 9216  }
  0x11   : > { %1492 = vsyncadd (%p1399_p2), [#allocation7], 4294958080  ;;  %p300_p6 = scmp.lt.s32.totalorder %s1361_s28, 1  ;;  %v484_v1 = vld [vmem:[%s2090_s2 + $0x1e8] sm:$0xff]  ;;  %s1501_s25 = smov 76   ;;  %vm309_vm0 = vcmask 130048  }
  0x12   : > { %v480_v2 = vld [vmem:[%s2090_s2 + $0x1c8] sm:$0xff]  ;;  %549 = vmatpush.msra.mxu2 %v484_v1  ;;  %v483_v4 = vld [vmem:[%s2090_s2 + $0x1e0] sm:$0xff]  ;;  %v1502_v5 = vmov 0.0   ;;  %v485_v11 = vld [vmem:[%s2090_s2 + $0x1f0] sm:$0xff]  ;;  %s1503_s8 = smov 68   ;;  %vm312_vm1 = vcmask 122880  }
  0x13   : > { %s2098_s28 = smov (!%p300_p6, %s1361_s28), 1  ;;  %v476_v3 = vld [vmem:[%s2090_s2 + $0x1a8] sm:$0xff]  ;;  %310 = vst.msk [vmem:[#allocation2 + $0x8] sm:$0xff] %vm309_vm0, %v1502_v5  ;;  %509 = vmatpush.msra.mxu0 %v483_v4  ;;  %v491_v7 = vld [vmem:[%s2090_s2 + $0x220] sm:$0xff]  ;;  %v481_v14 = vld [vmem:[%s2090_s2 + $0x1d0] sm:$0xff]  ;;  %vm343_vm2 = vcmask 97280  }
  0x14   : > { %s1370_s16 = sshll.u32 %s2098_s28, 3  ;;  %550 = vmatpush.msra.mxu2 %v480_v2  ;;  %v472_v6 = vld [vmem:[%s2090_s2 + $0x188] sm:$0xff]  ;;  %v479_v8 = vld [vmem:[%s2090_s2 + $0x1c0] sm:$0xff]  ;;  %308 = vst [vmem:[#allocation2] sm:$0xff] %v1502_v5  ;;  %543 = vmatpush.msra.mxu1 %v491_v7  ;;  %v477_v17 = vld [vmem:[%s2090_s2 + $0x1b0] sm:$0xff]  ;;  %vm332_vm3 = vcmask 556065  }
  0x15   : > { %s303_s19 = scalar_lea.vmem %s2088_s0, %s1370_s16  ;;  %v487_v10 = vld [vmem:[%s2090_s2 + $0x200] sm:$0xff]  ;;  %311 = vst [vmem:[#allocation2 + $0x10] sm:$0x1] %v1502_v5  ;;  %v468_v12 = vld [vmem:[%s2090_s2 + $0x168] sm:$0xff]  ;;  %510 = vmatpush.msra.mxu0 %v479_v8  ;;  %v473_v20 = vld [vmem:[%s2090_s2 + $0x190] sm:$0xff]  ;;  %vm334_vm4 = vcmask 548896   ;;  %s307_s18 = scalar_lea.vmem %s2095_s7, %s1370_s16 }
  0x16   : > { %v336_v0 = vld [vmem:[%s303_s19] sm:$0xff]  ;;  %551 = vmatpush.msra.mxu2 %v476_v3  ;;  %314 = vst [vmem:[#allocation3] sm:$0xff] %v1502_v5  ;;  %544 = vmatpush.msra.mxu1 %v487_v10  ;;  %v464_v16 = vld [vmem:[%s2090_s2 + $0x148] sm:$0xff]  ;;  %v469_v23 = vld [vmem:[%s2090_s2 + $0x170] sm:$0xff]  ;;  %vm341_vm5 = vcmask 1048160   ;;  %vm499_vm6 = vcmask 1046528  }
  0x17   : > { %338 = vrot.lane.b32.xlu0 %v336_v0, %s1501_s25  ;;  %v328_v9 = vrot.slane %v336_v0, 7  ;;  %v475_v13 = vld [vmem:[%s2090_s2 + $0x1a0] sm:$0xff]  ;;  %315 = vst [vmem:[#allocation3 + $0x8] sm:$0xff] %v1502_v5  ;;  %v460_v19 = vld [vmem:[%s2090_s2 + $0x128] sm:$0xff]  ;;  %v465_v26 = vld [vmem:[%s2090_s2 + $0x150] sm:$0xff]  ;;  %s1504_s11 = smov 48  }
  0x18   : > { %552 = vmatpush.msra.mxu2 %v472_v6  ;;  %v471_v15 = vld [vmem:[%s2090_s2 + $0x180] sm:$0xff]  ;;  %589 = vmatpush.msrb.mxu1 %v485_v11  ;;  %316 = vst [vmem:[#allocation3 + $0x10] sm:$0xff] %v1502_v5  ;;  %v456_v22 = vld [vmem:[%s2090_s2 + $0x108] sm:$0xff]  ;;  %v461_v37 = vld [vmem:[%s2090_s2 + $0x130] sm:$0xff]  ;;  %s1505_s12 = smov 16   ;;  %vm318_vm7 = vcmask 523264  }
  0x19   : > { %511 = vmatpush.msra.mxu0 %v475_v13  ;;  %v467_v18 = vld [vmem:[%s2090_s2 + $0x160] sm:$0xff]  ;;  %320 = vst [vmem:[#allocation3 + $0x28] sm:$0x1] %v1502_v5  ;;  %v452_v25 = vld [vmem:[%s2090_s2 + $0xe8] sm:$0xff]  ;;  %v457_v40 = vld [vmem:[%s2090_s2 + $0x110] sm:$0xff]  ;;  %vm324_vm8 = vcmask 516096  }
  0x1a   : > { %553 = vmatpush.msra.mxu2 %v468_v12  ;;  %590 = vmatpush.msrb.mxu1 %v481_v14  ;;  %321 = vst [vmem:[#allocation3 + $0x30] sm:$0x1] %v1502_v5  ;;  %v463_v21 = vld [vmem:[%s2090_s2 + $0x140] sm:$0xff]  ;;  %v448_v27 = vld [vmem:[%s2090_s2 + $0xc8] sm:$0xff]  ;;  %v453_v44 = vld [vmem:[%s2090_s2 + $0xf0] sm:$0xff]  ;;  %vm877_vm9 = vcmask 392192  }
  0x1b   : > { %512 = vmatpush.msra.mxu0 %v471_v15  ;;  %322 = vst [vmem:[#allocation3 + $0x38] sm:$0x1] %v1502_v5  ;;  %v459_v24 = vld [vmem:[%s2090_s2 + $0x120] sm:$0xff]  ;;  %v444_v28 = vld [vmem:[%s2090_s2 + $0xa8] sm:$0xff]  ;;  %v449_v48 = vld [vmem:[%s2090_s2 + $0xd0] sm:$0xff]  ;;  %vm862_vm10 = vcmask 1047681  }
  0x1c   : > { %554 = vmatpush.msra.mxu2 %v464_v16  ;;  %591 = vmatpush.msrb.mxu1 %v477_v17  ;;  %323 = vst [vmem:[#allocation3 + $0x40] sm:$0x1] %v1502_v5  ;;  %v440_v29 = vld [vmem:[%s2090_s2 + $0x88] sm:$0xff]  ;;  %v411_v34 = vld [vmem:[%s2089_s1 + $0x1e0] sm:$0xff]  ;;  %v493_v51 = vld [vmem:[%s2090_s2 + $0x230] sm:$0xff]  ;;  %vm867_vm11 = vcmask 1040512  }
  0x1d   : > { %513 = vmatpush.msra.mxu0 %v467_v18  ;;  %v436_v30 = vld [vmem:[%s2090_s2 + $0x68] sm:$0xff]  ;;  %v407_v35 = vld [vmem:[%s2089_s1 + $0x1c0] sm:$0xff]  ;;  %313 = vst.msk [vmem:[#allocation2 + $0x18] sm:$0x1] %vm312_vm1, %v1502_v5  ;;  %v445_v52 = vld [vmem:[%s2090_s2 + $0xb0] sm:$0xff]  ;;  %vm865_vm12 = vcmask 130049  }
  0x1e   : > { %555 = vmatpush.msra.mxu2 %v460_v19  ;;  %592 = vmatpush.msrb.mxu1 %v473_v20  ;;  %v432_v31 = vld [vmem:[%s2090_s2 + $0x48] sm:$0xff]  ;;  %v455_v36 = vld [vmem:[%s2090_s2 + $0x100] sm:$0xff]  ;;  %v489_v55 = vld [vmem:[%s2090_s2 + $0x210] sm:$0xff]  ;;  %319 = vst.msk [vmem:[#allocation3 + $0x20] sm:$0xff] %vm318_vm7, %v1502_v5  ;;  %vm882_vm13 = vcmask 1047936  }
  0x1f   : > { %329 = vrot.lane.b32.xlu0 %v328_v9, %s1503_s8  ;;  %514 = vmatpush.msra.mxu0 %v463_v21  ;;  %v428_v32 = vld [vmem:[%s2090_s2 + $0x28] sm:$0xff]  ;;  %v403_v38 = vld [vmem:[%s2089_s1 + $0x1a0] sm:$0xff]  ;;  %v441_v56 = vld [vmem:[%s2090_s2 + $0x90] sm:$0xff]  ;;  %325 = vst.msk [vmem:[#allocation3 + $0x48] sm:$0x1] %vm324_vm8, %v1502_v5 }
  0x20   : > { %556 = vmatpush.msra.mxu2 %v456_v22  ;;  %593 = vmatpush.msrb.mxu1 %v469_v23  ;;  %v424_v33 = vld [vmem:[%s2090_s2 + $0x8] sm:$0xff]  ;;  %v451_v39 = vld [vmem:[%s2090_s2 + $0xe0] sm:$0xff]  ;;  %v437_v59 = vld [vmem:[%s2090_s2 + $0x70] sm:$0xff] }
  0x21   : > { %515 = vmatpush.msra.mxu0 %v459_v24  ;;  %v399_v41 = vld [vmem:[%s2089_s1 + $0x180] sm:$0xff]  ;;  %v492_v43 = vld [vmem:[%s2090_s2 + $0x228] sm:$0xff]  ;;  %v433_v62 = vld [vmem:[%s2090_s2 + $0x50] sm:$0xff] }
  0x22   : > { %557 = vmatpush.msra.mxu2 %v452_v25  ;;  %594 = vmatpush.msrb.mxu1 %v465_v26  ;;  %v447_v42 = vld [vmem:[%s2090_s2 + $0xc0] sm:$0xff]  ;;  %v488_v47 = vld [vmem:[%s2090_s2 + $0x208] sm:$0xff]  ;;  %v429_v1 = vld [vmem:[%s2090_s2 + $0x30] sm:$0xff] }
  0x23   : > { %516 = vmatpush.msra.mxu0 %v455_v36  ;;  %v395_v45 = vld [vmem:[%s2089_s1 + $0x160] sm:$0xff]  ;;  %583 = vmatpush.msra.mxu3 %v492_v43  ;;  %v494_v2 = vld [vmem:[%s2090_s2 + $0x238] sm:$0xff]  ;;  %v425_v4 = vld [vmem:[%s2090_s2 + $0x10] sm:$0xff] }
  0x24   : > { %558 = vmatpush.msra.mxu2 %v448_v27  ;;  %595 = vmatpush.msrb.mxu1 %v461_v37  ;;  %v443_v46 = vld [vmem:[%s2090_s2 + $0xa0] sm:$0xff]  ;;  %v490_v6 = vld [vmem:[%s2090_s2 + $0x218] sm:$0xff]  ;;  %v420_v19 = vld [vmem:[%s2089_s1 + $0x228] sm:$0xff] }
  0x25   : > { %517 = vmatpush.msra.mxu0 %v451_v39  ;;  %v391_v49 = vld [vmem:[%s2089_s1 + $0x140] sm:$0xff]  ;;  %584 = vmatpush.msra.mxu3 %v488_v47  ;;  %v350_v13 = vld [vmem:[#allocation2 + $0x18] sm:$0x1]  ;;  %v416_v22 = vld [vmem:[%s2089_s1 + $0x208] sm:$0xff] }
  0x26   : > { %559 = vmatpush.msra.mxu2 %v444_v28  ;;  %596 = vmatpush.msrb.mxu1 %v457_v40  ;;  %v439_v50 = vld [vmem:[%s2090_s2 + $0x80] sm:$0xff]  ;;  %v504_v14 = vrot.slane %v350_v13, 1  ;;  %v486_v18 = vld [vmem:[%s2090_s2 + $0x1f8] sm:$0xff]  ;;  %v417_v37 = vld [vmem:[%s2089_s1 + $0x210] sm:$0xff] }
  0x27   : > { %518 = vmatpush.msra.mxu0 %v447_v42  ;;  %623 = vmatpush.msrb.mxu3 %v493_v51  ;;  %v387_v53 = vld [vmem:[%s2089_s1 + $0x120] sm:$0xff]  ;;  %v482_v21 = vld [vmem:[%s2090_s2 + $0x1d8] sm:$0xff]  ;;  %v396_v43 = vld [vmem:[%s2089_s1 + $0x168] sm:$0xff] }
  0x28   : > { %560 = vmatpush.msra.mxu2 %v440_v29  ;;  %597 = vmatpush.msrb.mxu1 %v453_v44  ;;  %v435_v54 = vld [vmem:[%s2090_s2 + $0x60] sm:$0xff]  ;;  %v478_v23 = vld [vmem:[%s2090_s2 + $0x1b8] sm:$0xff]  ;;  %v392_v47 = vld [vmem:[%s2089_s1 + $0x148] sm:$0xff] }
  0x29   : > { %519 = vmatpush.msra.mxu0 %v443_v46  ;;  %624 = vmatpush.msrb.mxu3 %v489_v55  ;;  %v383_v57 = vld [vmem:[%s2089_s1 + $0x100] sm:$0xff]  ;;  %v474_v24 = vld [vmem:[%s2090_s2 + $0x198] sm:$0xff]  ;;  %v388_v51 = vld [vmem:[%s2089_s1 + $0x128] sm:$0xff] }
  0x2a   : > { %561 = vmatpush.msra.mxu2 %v436_v30  ;;  %598 = vmatpush.msrb.mxu1 %v449_v48  ;;  %v431_v58 = vld [vmem:[%s2090_s2 + $0x40] sm:$0xff]  ;;  %v470_v26 = vld [vmem:[%s2090_s2 + $0x178] sm:$0xff]  ;;  %v412_v30 = vld [vmem:[%s2089_s1 + $0x1e8] sm:$0xff] }
  0x2b   : > { %520 = vmatpush.msra.mxu0 %v439_v50  ;;  %v379_v60 = vld [vmem:[%s2089_s1 + $0xe0] sm:$0xff]  ;;  %v462_v36 = vld [vmem:[%s2090_s2 + $0x138] sm:$0xff]  ;;  %v356_v13 = vld [vmem:[%s2089_s1 + $0x28] sm:$0xff] }
  0x2c   : > { %562 = vmatpush.msra.mxu2 %v432_v31  ;;  %599 = vmatpush.msrb.mxu1 %v445_v52  ;;  %v427_v61 = vld [vmem:[%s2090_s2 + $0x20] sm:$0xff]  ;;  %v418_v39 = vld [vmem:[%s2089_s1 + $0x218] sm:$0xff] }
  0x2d   : > { %521 = vmatpush.msra.mxu0 %v435_v54  ;;  %v375_v63 = vld [vmem:[%s2089_s1 + $0xc0] sm:$0xff]  ;;  %v458_v40 = vld [vmem:[%s2090_s2 + $0x118] sm:$0xff]  ;;  %v384_v54 = vld [vmem:[%s2089_s1 + $0x108] sm:$0xff] }
  0x2e   : > { %563 = vmatpush.msra.mxu2 %v428_v32  ;;  %600 = vmatpush.msrb.mxu1 %v441_v56  ;;  %v423_v0 = vld [vmem:[%s2090_s2] sm:$0xff]  ;;  %v466_v32 = vld [vmem:[%s2090_s2 + $0x158] sm:$0xff] }
  0x2f   : > { %522 = vmatpush.msra.mxu0 %v431_v58  ;;  %v371_v3 = vld [vmem:[%s2089_s1 + $0xa0] sm:$0xff]  ;;  %v454_v42 = vld [vmem:[%s2090_s2 + $0xf8] sm:$0xff] }
  0x30   : > { %564 = vmatpush.msra.mxu2 %v424_v33  ;;  %601 = vmatpush.msrb.mxu1 %v437_v59  ;;  %v367_v7 = vld [vmem:[%s2089_s1 + $0x80] sm:$0xff]  ;;  %v421_v33 = vld [vmem:[%s2089_s1 + $0x230] sm:$0xff]  ;;  %v450_v44 = vld [vmem:[%s2090_s2 + $0xd8] sm:$0xff] }
  0x31   : > { %523 = vmatpush.msra.mxu0 %v427_v61  ;;  %v363_v8 = vld [vmem:[%s2089_s1 + $0x60] sm:$0xff]  ;;  %v414_v46 = vld [vmem:[%s2089_s1 + $0x1f8] sm:$0xff] }
  0x32   : > { %672 = vmatpush.msrb.mxu2 %v411_v34  ;;  %602 = vmatpush.msrb.mxu1 %v433_v62  ;;  %v359_v9 = vld [vmem:[%s2089_s1 + $0x40] sm:$0xff]  ;;  %v408_v34 = vld [vmem:[%s2089_s1 + $0x1c8] sm:$0xff]  ;;  %v410_v50 = vld [vmem:[%s2089_s1 + $0x1d8] sm:$0xff] }
  0x33   : > { %524 = vmatpush.msra.mxu0 %v423_v0  ;;  %v355_v10 = vld [vmem:[%s2089_s1 + $0x20] sm:$0xff]  ;;  %v442_v52 = vld [vmem:[%s2090_s2 + $0x98] sm:$0xff] }
  0x34   : > { %673 = vmatpush.msrb.mxu2 %v407_v35  ;;  %603 = vmatpush.msrb.mxu1 %v429_v1  ;;  %v351_v11 = vld [vmem:[%s2089_s1] sm:$0xff]  ;;  %v422_v35 = vld [vmem:[%s2089_s1 + $0x238] sm:$0xff] }
  0x35   : > { %663 = vmatpush.msrb.mxu0 %v494_v2  ;;  %v438_v55 = vld [vmem:[%s2090_s2 + $0x78] sm:$0xff]  ;;  %v368_v2 = vld [vmem:[%s2089_s1 + $0x88] sm:$0xff]  ;;  %v1019_v5 = vld [vmem:[#allocation6 + $0x170] sm:$0xff] }
  0x36   : > { %674 = vmatpush.msrb.mxu2 %v403_v38  ;;  %604 = vmatpush.msrb.mxu1 %v425_v4  ;;  %v404_v38 = vld [vmem:[%s2089_s1 + $0x1a8] sm:$0xff]  ;;  %v402_v56 = vld [vmem:[%s2089_s1 + $0x198] sm:$0xff] }
  0x37   : > { %664 = vmatpush.msrb.mxu0 %v490_v6  ;;  %v398_v58 = vld [vmem:[%s2089_s1 + $0x178] sm:$0xff]  ;;  %v364_v6 = vld [vmem:[%s2089_s1 + $0x68] sm:$0xff] }
  0x38   : > { %675 = vmatpush.msrb.mxu2 %v399_v41  ;;  %v400_v41 = vld [vmem:[%s2089_s1 + $0x188] sm:$0xff]  ;;  %v434_v59 = vld [vmem:[%s2090_s2 + $0x58] sm:$0xff] }
  0x39   : > { %v394_v61 = vld [vmem:[%s2089_s1 + $0x158] sm:$0xff] }
  0x3a   : > { %676 = vmatpush.msrb.mxu2 %v395_v45  ;;  %v430_v62 = vld [vmem:[%s2090_s2 + $0x38] sm:$0xff] }
  0x3b   : > { %v390_v0 = vld [vmem:[%s2089_s1 + $0x138] sm:$0xff] }
  0x3c   : > { %677 = vmatpush.msrb.mxu2 %v391_v49  ;;  %v446_v49 = vld [vmem:[%s2090_s2 + $0xb8] sm:$0xff] }
  0x3d   : > { %v426_v1 = vld [vmem:[%s2090_s2 + $0x18] sm:$0xff] }
  0x3e   : > { %678 = vmatpush.msrb.mxu2 %v387_v53  ;;  %v406_v53 = vld [vmem:[%s2089_s1 + $0x1b8] sm:$0xff] }
  0x3f   : > { %v386_v4 = vld [vmem:[%s2089_s1 + $0x118] sm:$0xff] }
  0x40   : > { %679 = vmatpush.msrb.mxu2 %v383_v57  ;;  %v380_v57 = vld [vmem:[%s2089_s1 + $0xe8] sm:$0xff] }
  0x42   : > { %680 = vmatpush.msrb.mxu2 %v379_v60  ;;  %v376_v60 = vld [vmem:[%s2089_s1 + $0xc8] sm:$0xff] }
  0x44   : > { %681 = vmatpush.msrb.mxu2 %v375_v63  ;;  %v372_v63 = vld [vmem:[%s2089_s1 + $0xa8] sm:$0xff] }
  0x46   : > { %682 = vmatpush.msrb.mxu2 %v371_v3  ;;  %v419_v3 = vld [vmem:[%s2089_s1 + $0x220] sm:$0xff] }
  0x48   : > { %683 = vmatpush.msrb.mxu2 %v367_v7  ;;  %v415_v7 = vld [vmem:[%s2089_s1 + $0x200] sm:$0xff] }
  0x4a   : > { %684 = vmatpush.msrb.mxu2 %v363_v8  ;;  %v382_v8 = vld [vmem:[%s2089_s1 + $0xf8] sm:$0xff] }
  0x4c   : > { %685 = vmatpush.msrb.mxu2 %v359_v9  ;;  %v413_v9 = vld [vmem:[%s2089_s1 + $0x1f0] sm:$0xff] }
  0x4e   : > { %686 = vmatpush.msrb.mxu2 %v355_v10  ;;  %v360_v10 = vld [vmem:[%s2089_s1 + $0x48] sm:$0xff] }
  0x50   : > { %687 = vmatpush.msrb.mxu2 %v351_v11  ;;  %v378_v11 = vld [vmem:[%s2089_s1 + $0xd8] sm:$0xff] }
  0x89   : > { %v339_v12 = vpop.permute.xlu0 %338 }
  0x8a   : > { %344 = vst.msk [vmem:[#allocation2 + $0x8] sm:$0xff] %vm343_vm2, %v339_v12 }
  0x91   : > { %v330_v15 = vpop.permute.xlu0 %329  ;;  %v348_v16 = vld [vmem:[#allocation2 + $0x8] sm:$0xfe] }
  0x92   : > { %333 = vst.msk [vmem:[#allocation2] sm:$0xfe] %vm332_vm3, %v330_v15  ;;  %v503_v17 = vrot.slane %v348_v16, 1  ;;  %v1893_v48 = vld [vmem:[#allocation2 + $0x8] sm:$0xff] }
  0x93   : > { %335 = vst.msk [vmem:[#allocation2 + $0x10] sm:$0x1] %vm334_vm4, %v330_v15  ;;  %v405_v15 = vld [vmem:[%s2089_s1 + $0x1b0] sm:$0xff]  ;;  %v352_v16 = vld [vmem:[%s2089_s1 + $0x8] sm:$0xff] }
  0x94   : > { %342 = vst.msk [vmem:[#allocation2] sm:$0xff] %vm341_vm5, %v339_v12  ;;  %v505_v20 = vsel %vm499_vm6, %v503_v17, %v504_v14  ;;  %v409_v12 = vld [vmem:[%s2089_s1 + $0x1d0] sm:$0xff]  ;;  %v374_v14 = vld [vmem:[%s2089_s1 + $0xb8] sm:$0xff] }
  0x95   : > { %1372 = vmatmul.msk.f32.vlgmr.msra.gmra.mxu1 %vm309_vm0, %v505_v20  ;;  %1373 = vmatmul.msk.f32.vlgmr.msra.gmra.mxu3 %vm309_vm0, %v505_v20  ;;  %v370_v17 = vld [vmem:[%s2089_s1 + $0x98] sm:$0xff] }
  0x96   : > { %629 = vmatpush.msra.mxu3 %v486_v18  ;;  %746 = vmatpush.msra.mxu1 %v420_v19  ;;  %v401_v18 = vld [vmem:[%s2089_s1 + $0x190] sm:$0xff]  ;;  %v366_v19 = vld [vmem:[%s2089_s1 + $0x78] sm:$0xff] }
  0x98   : > { %630 = vmatpush.msra.mxu3 %v482_v21  ;;  %747 = vmatpush.msra.mxu1 %v416_v22  ;;  %v362_v21 = vld [vmem:[%s2089_s1 + $0x58] sm:$0xff]  ;;  %v393_v22 = vld [vmem:[%s2089_s1 + $0x150] sm:$0xff] }
  0x9a   : > { %631 = vmatpush.msra.mxu3 %v478_v23  ;;  %v349_v25 = vld [vmem:[#allocation2 + $0x10] sm:$0x1]  ;;  %v358_v23 = vld [vmem:[%s2089_s1 + $0x38] sm:$0xff] }
  0x9b   : > { %v347_v27 = vld [vmem:[#allocation2] sm:$0xfe]  ;;  %v501_v28 = vrot.slane %v349_v25, 1  ;;  %v354_v25 = vld [vmem:[%s2089_s1 + $0x18] sm:$0xff] }
  0x9c   : > { %632 = vmatpush.msra.mxu3 %v474_v24  ;;  %v500_v29 = vrot.slane %v347_v27, 1  ;;  %v1884_v45 = vld [vmem:[#allocation2] sm:$0xff]  ;;  %v389_v24 = vld [vmem:[%s2089_s1 + $0x130] sm:$0xff] }
  0x9d   : > { %1374 = vmatmul.msk.f32.vlgmr.msrb.gmra.mxu3 %vm309_vm0, %v505_v20  ;;  %v381_v27 = vld [vmem:[%s2089_s1 + $0xf0] sm:$0xff] }
  0x9e   : > { %633 = vmatpush.msra.mxu3 %v470_v26  ;;  %v1839_v31 = vsel %vm499_vm6, %v500_v29, %v501_v28  ;;  %v385_v26 = vld [vmem:[%s2089_s1 + $0x110] sm:$0xff] }
  0x9f   : > { %525 = vmatmul.f32.vlgmr.msra.gmra.mxu0 %v1839_v31  ;;  %565 = vmatmul.f32.vlgmr.msra.gmra.mxu2 %v1839_v31  ;;  %v377_v28 = vld [vmem:[%s2089_s1 + $0xd0] sm:$0xff] }
  0xa0   : > { %605 = vmatmul.f32.vlgmr.msrb.gmra.mxu1 %v1839_v31  ;;  %712 = vmatpush.msra.mxu0 %v412_v30  ;;  %v373_v29 = vld [vmem:[%s2089_s1 + $0xb0] sm:$0xff] }
  0xa1   : > { %634 = vmatpush.msra.mxu3 %v466_v32  ;;  %786 = vmatpush.msrb.mxu1 %v421_v33  ;;  %v369_v30 = vld [vmem:[%s2089_s1 + $0x90] sm:$0xff] }
  0xa2   : > { %713 = vmatpush.msra.mxu0 %v408_v34  ;;  %826 = vmatpush.msra.mxu2 %v422_v35  ;;  %v361_v32 = vld [vmem:[%s2089_s1 + $0x50] sm:$0xff] }
  0xa3   : > { %635 = vmatpush.msra.mxu3 %v462_v36  ;;  %787 = vmatpush.msrb.mxu1 %v417_v37  ;;  %v357_v33 = vld [vmem:[%s2089_s1 + $0x30] sm:$0xff] }
  0xa4   : > { %714 = vmatpush.msra.mxu0 %v404_v38  ;;  %827 = vmatpush.msra.mxu2 %v418_v39  ;;  %v353_v34 = vld [vmem:[%s2089_s1 + $0x10] sm:$0xff] }
  0xa5   : > { %636 = vmatpush.msra.mxu3 %v458_v40 }
  0xa6   : > { %715 = vmatpush.msra.mxu0 %v400_v41 }
  0xa7   : > { %637 = vmatpush.msra.mxu3 %v454_v42  ;;  %1375 = vmatmul.msk.f32.vlgmr.msrb.gmra.mxu0 %vm309_vm0, %v505_v20  ;;  %v397_v20 = vld [vmem:[%s2089_s1 + $0x170] sm:$0xff] }
  0xa8   : > { %688 = vmatmul.f32.vlgmr.msrb.gmra.mxu2 %v1884_v45  ;;  %716 = vmatpush.msra.mxu0 %v396_v43 }
  0xa9   : > { %1377 = vmatmul.msk.f32.vlgmr.msra.gmra.mxu1 %vm309_vm0, %v1893_v48  ;;  %638 = vmatpush.msra.mxu3 %v450_v44 }
  0xaa   : > { %792 = vmatpush.msra.mxu1 %v414_v46  ;;  %717 = vmatpush.msra.mxu0 %v392_v47  ;;  %v832_v47 = vld [vmem:[%s2091_s3] sm:$0xf] }
  0xab   : > { %639 = vmatpush.msra.mxu3 %v446_v49 }
  0xac   : > { %793 = vmatpush.msra.mxu1 %v410_v50  ;;  %718 = vmatpush.msra.mxu0 %v388_v51  ;;  %v834_v50 = vperm.slane %v832_v47, 0 }
  0xad   : > { %640 = vmatpush.msra.mxu3 %v442_v52 }
  0xae   : > { %794 = vmatpush.msra.mxu1 %v406_v53  ;;  %719 = vmatpush.msra.mxu0 %v384_v54 }
  0xaf   : > { %641 = vmatpush.msra.mxu3 %v438_v55 }
  0xb0   : > { %795 = vmatpush.msra.mxu1 %v402_v56  ;;  %720 = vmatpush.msra.mxu0 %v380_v57  ;;  %v835_v57 = vperm.slane %v832_v47, 1 }
  0xb1   : > { %1378 = vmatmul.msk.f32.vlgmr.msrb.gmra.mxu1 %vm309_vm0, %v1893_v48  ;;  %1379 = vmatmul.msk.f32.vlgmr.msra.gmra.mxu2 %vm309_vm0, %v1893_v48 }
  0xb2   : > { %796 = vmatpush.msra.mxu1 %v398_v58  ;;  %642 = vmatpush.msra.mxu3 %v434_v59 }
  0xb3   : > { %721 = vmatpush.msra.mxu0 %v376_v60  ;;  %v1036_v60 = vld [vmem:[#allocation6 + $0x1f8] sm:$0xff] }
  0xb4   : > { %797 = vmatpush.msra.mxu1 %v394_v61  ;;  %643 = vmatpush.msra.mxu3 %v430_v62  ;;  %v1035_v61 = vld [vmem:[#allocation6 + $0x1f0] sm:$0xff]  ;;  %v1034_v62 = vld [vmem:[#allocation6 + $0x1e8] sm:$0xff] }
  0xb5   : > { %722 = vmatpush.msra.mxu0 %v372_v63 }
  0xb6   : > { %798 = vmatpush.msra.mxu1 %v390_v0  ;;  %644 = vmatpush.msra.mxu3 %v426_v1  ;;  %v1033_v0 = vld [vmem:[#allocation6 + $0x1e0] sm:$0xff]  ;;  %v1032_v1 = vld [vmem:[#allocation6 + $0x1d8] sm:$0xff] }
  0xb7   : > { %645 = vmatmul.f32.vlgmr.msra.gmra.mxu3 %v1839_v31  ;;  %723 = vmatpush.msra.mxu0 %v368_v2  ;;  %v365_v31 = vld [vmem:[%s2089_s1 + $0x70] sm:$0xff]  ;;  %v1031_v2 = vld [vmem:[#allocation6 + $0x1d0] sm:$0xff] }
  0xb8   : > { %706 = vmatpush.msrb.mxu3 %v419_v3  ;;  %799 = vmatpush.msra.mxu1 %v386_v4  ;;  %v1030_v3 = vld [vmem:[#allocation6 + $0x1c8] sm:$0xff] }
  0xb9   : > { %724 = vmatpush.msra.mxu0 %v364_v6 }
  0xba   : > { %707 = vmatpush.msrb.mxu3 %v415_v7  ;;  %800 = vmatpush.msra.mxu1 %v382_v8  ;;  %v1029_v8 = vld [vmem:[#allocation6 + $0x1c0] sm:$0xff] }
  0xbb   : > { %725 = vmatpush.msra.mxu0 %v360_v10 }
  0xbc   : > { %752 = vmatpush.msra.mxu3 %v413_v9  ;;  %801 = vmatpush.msra.mxu1 %v378_v11 }
  0xbd   : > { %726 = vmatpush.msra.mxu0 %v356_v13  ;;  %v1028_v13 = vld [vmem:[#allocation6 + $0x1b8] sm:$0xff] }
  0xbe   : > { %753 = vmatpush.msra.mxu3 %v409_v12  ;;  %802 = vmatpush.msra.mxu1 %v374_v14  ;;  %v836_v12 = vperm.slane %v832_v47, 2 }
  0xbf   : > { %727 = vmatpush.msra.mxu0 %v352_v16  ;;  %1376 = vmatmul.msk.f32.vlgmr.msrb.gmra.mxu3 %vm309_vm0, %v1893_v48 }
  0xc0   : > { %754 = vmatpush.msra.mxu3 %v405_v15  ;;  %803 = vmatpush.msra.mxu1 %v370_v17  ;;  %v1027_v15 = vld [vmem:[#allocation6 + $0x1b0] sm:$0xff] }
  0xc1   : > { %728 = vmatmul.f32.vlgmr.msra.gmra.mxu0 %v1884_v45 }
  0xc2   : > { %755 = vmatpush.msra.mxu3 %v401_v18  ;;  %804 = vmatpush.msra.mxu1 %v366_v19  ;;  %v837_v18 = vperm.slane %v832_v47, 3  ;;  %v1001_v47 = vld [vmem:[#allocation6 + $0xe0] sm:$0xff] }
  0xc4   : > { %756 = vmatpush.msra.mxu3 %v397_v20  ;;  %805 = vmatpush.msra.mxu1 %v362_v21  ;;  %v1026_v20 = vld [vmem:[#allocation6 + $0x1a8] sm:$0xff] }
  0xc6   : > { %757 = vmatpush.msra.mxu3 %v393_v22  ;;  %806 = vmatpush.msra.mxu1 %v358_v23  ;;  %v1025_v22 = vld [vmem:[#allocation6 + $0x1a0] sm:$0xff] }
  0xc8   : > { %758 = vmatpush.msra.mxu3 %v389_v24  ;;  %807 = vmatpush.msra.mxu1 %v354_v25  ;;  %v1024_v25 = vld [vmem:[#allocation6 + $0x198] sm:$0xff] }
  0xc9   : > { %808 = vmatmul.f32.vlgmr.msra.gmra.mxu1 %v1884_v45 }
  0xca   : > { %759 = vmatpush.msra.mxu3 %v385_v26  ;;  %1136 = vmatpush.msrb.mxu1 %v1036_v60  ;;  %v1023_v26 = vld [vmem:[#allocation6 + $0x190] sm:$0xff]  ;;  %v984_v60 = vld [vmem:[#allocation6 + $0x58] sm:$0xff] }
  0xcc   : > { %760 = vmatpush.msra.mxu3 %v381_v27  ;;  %1137 = vmatpush.msrb.mxu1 %v1035_v61  ;;  %v997_v61 = vld [vmem:[#allocation6 + $0xc0] sm:$0xff] }
  0xce   : > { %761 = vmatpush.msra.mxu3 %v377_v28  ;;  %1138 = vmatpush.msrb.mxu1 %v1034_v62  ;;  %v1022_v28 = vld [vmem:[#allocation6 + $0x188] sm:$0xff]  ;;  %v949_v62 = vld [vmem:[#allocation4 + $0x180] sm:$0xff] }
  0xd0   : > { %762 = vmatpush.msra.mxu3 %v373_v29  ;;  %1139 = vmatpush.msrb.mxu1 %v1033_v0  ;;  %v1021_v29 = vld [vmem:[#allocation6 + $0x180] sm:$0xff]  ;;  %v983_v0 = vld [vmem:[#allocation6 + $0x50] sm:$0xff] }
  0xd2   : > { %763 = vmatpush.msra.mxu3 %v369_v30  ;;  %1140 = vmatpush.msrb.mxu1 %v1032_v1  ;;  %v964_v30 = vld [vmem:[#allocation4 + $0x1f8] sm:$0xff] }
  0xd3   : > { %v996_v1 = vld [vmem:[#allocation6 + $0xb8] sm:$0xff] }
  0xd4   : > { %764 = vmatpush.msra.mxu3 %v365_v31  ;;  %1141 = vmatpush.msrb.mxu1 %v1031_v2  ;;  %v1015_v2 = vld [vmem:[#allocation6 + $0x150] sm:$0xff] }
  0xd6   : > { %765 = vmatpush.msra.mxu3 %v361_v32  ;;  %1142 = vmatpush.msrb.mxu1 %v1030_v3  ;;  %v963_v32 = vld [vmem:[#allocation4 + $0x1f0] sm:$0xff]  ;;  %v982_v3 = vld [vmem:[#allocation6 + $0x48] sm:$0xff] }
  0xd8   : > { %766 = vmatpush.msra.mxu3 %v357_v33  ;;  %1143 = vmatpush.msrb.mxu1 %v1029_v8  ;;  %v962_v33 = vld [vmem:[#allocation4 + $0x1e8] sm:$0xff] }
  0xd9   : > { %v994_v8 = vld [vmem:[#allocation6 + $0xa8] sm:$0xff] }
  0xda   : > { %767 = vmatpush.msra.mxu3 %v353_v34  ;;  %1144 = vmatpush.msrb.mxu1 %v1028_v13  ;;  %v961_v34 = vld [vmem:[#allocation4 + $0x1e0] sm:$0xff]  ;;  %v1012_v13 = vld [vmem:[#allocation6 + $0x138] sm:$0xff] }
  0xdb   : > { %768 = vmatmul.f32.vlgmr.msra.gmra.mxu3 %v1884_v45 }
  0xdc   : > { %1145 = vmatpush.msrb.mxu1 %v1027_v15  ;;  %v992_v15 = vld [vmem:[#allocation6 + $0x98] sm:$0xff] }
  0xde   : > { %1146 = vmatpush.msrb.mxu1 %v1026_v20  ;;  %v977_v20 = vld [vmem:[#allocation6 + $0x20] sm:$0xff] }
  0xe0   : > { %1147 = vmatpush.msrb.mxu1 %v1025_v22 }
  0xe2   : > { %1148 = vmatpush.msrb.mxu1 %v1024_v25  ;;  %v976_v25 = vld [vmem:[#allocation6 + $0x18] sm:$0xff] }
  0xe4   : > { %1149 = vmatpush.msrb.mxu1 %v1023_v26  ;;  %v989_v26 = vld [vmem:[#allocation6 + $0x80] sm:$0xff] }
  0xe6   : > { %1150 = vmatpush.msrb.mxu1 %v1022_v28  ;;  %v916_v28 = vld [vmem:[#allocation4 + $0x78] sm:$0xff] }
  0xe8   : > { %1151 = vmatpush.msrb.mxu1 %v1021_v29  ;;  %v975_v29 = vld [vmem:[#allocation6 + $0x10] sm:$0xff] }
  0xea   : > { %1239 = vmatpush.msra.mxu1 %v964_v30  ;;  %v1007_v30 = vld [vmem:[#allocation6 + $0x110] sm:$0xff] }
  0xec   : > { %1240 = vmatpush.msra.mxu1 %v963_v32  ;;  %v899_v32 = vld [vmem:[#allocation3 + $0x40] sm:$0x1] }
  0xee   : > { %1241 = vmatpush.msra.mxu1 %v962_v33  ;;  %v974_v33 = vld [vmem:[#allocation6 + $0x8] sm:$0xff] }
  0xf0   : > { %1242 = vmatpush.msra.mxu1 %v961_v34  ;;  %v1006_v34 = vld [vmem:[#allocation6 + $0x108] sm:$0xff] }
 0x112   : > { %v546_v38 = vpop.f32.mrf.mxu1 }
 0x118   : > { %v586_v35 = vpop.f32.mrf.mxu3 }
 0x11c   : > { %v526_v36 = vpop.f32.mrf.mxu0 }
 0x11d   : > { %v606_v42 = vpop.f32.mrf.mxu1  ;;  %v547_v44 = vadd.f32 %v546_v38, %v526_v36  ;;  %v959_v36 = vld [vmem:[#allocation4 + $0x1d0] sm:$0xff]  ;;  %v957_v38 = vld [vmem:[#allocation4 + $0x1c0] sm:$0xff] }
 0x120   : > { %v626_v37 = vpop.f32.mrf.mxu3 }
 0x121   : > { %v627_v6 = vadd.f32 %v626_v37, %v606_v42  ;;  %v958_v37 = vld [vmem:[#allocation4 + $0x1c8] sm:$0xff] }
 0x122   : > { %v566_v39 = vpop.f32.mrf.mxu2  ;;  %v1002_v42 = vld [vmem:[#allocation6 + $0xe8] sm:$0xff] }
 0x123   : > { %v587_v48 = vadd.f32 %v586_v35, %v566_v39  ;;  %v960_v35 = vld [vmem:[#allocation4 + $0x1d8] sm:$0xff] }
 0x124   : > { %v666_v40 = vpop.f32.mrf.mxu0  ;;  %1243 = vmatpush.msra.mxu1 %v960_v35  ;;  %v1004_v39 = vld [vmem:[#allocation6 + $0xf8] sm:$0xff]  ;;  %v914_v35 = vld [vmem:[#allocation4 + $0x68] sm:$0xff] }
 0x125   : > { %1096 = vmatpush.msrb.mxu2 %v1004_v39  ;;  %v1044_v39 = vld [vmem:[#allocation6 + $0x238] sm:$0xff] }
 0x126   : > { %v749_v54 = vpop.f32.mrf.mxu1  ;;  %1244 = vmatpush.msra.mxu1 %v959_v36  ;;  %v973_v36 = vld [vmem:[#allocation6] sm:$0xff] }
 0x128   : > { %1245 = vmatpush.msra.mxu1 %v958_v37  ;;  %v1065_v37 = vrot.slane %v899_v32, 1 }
 0x12a   : > { %1246 = vmatpush.msra.mxu1 %v957_v38  ;;  %v1005_v38 = vld [vmem:[#allocation6 + $0x100] sm:$0xff] }
 0x12b   : > { %v689_v43 = vpop.f32.mrf.mxu2 }
 0x12c   : > { %v690_v49 = vadd.f32 %v689_v43, %v547_v44  ;;  %v988_v43 = vld [vmem:[#allocation6 + $0x78] sm:$0xff]  ;;  %v955_v44 = vld [vmem:[#allocation4 + $0x1b0] sm:$0xff] }
 0x12d   : > { %1076 = vmatpush.msrb.mxu0 %v988_v43 }
 0x12e   : > { %v789_v63 = vpop.f32.mrf.mxu1 }
 0x134   : > { %v829_v16 = vpop.f32.mrf.mxu2 }
 0x13a   : > { %v646_v41 = vpop.f32.mrf.mxu3 }
 0x13b   : > { %v667_v7 = vadd.f32 %v666_v40, %v646_v41  ;;  %v956_v40 = vld [vmem:[#allocation4 + $0x1b8] sm:$0xff]  ;;  %v1003_v41 = vld [vmem:[#allocation6 + $0xf0] sm:$0xff] }
 0x13c   : > { %1097 = vmatpush.msrb.mxu2 %v1003_v41  ;;  %1247 = vmatpush.msra.mxu1 %v956_v40  ;;  %v913_v41 = vld [vmem:[#allocation4 + $0x60] sm:$0xff] }
 0x13e   : > { %v729_v46 = vpop.f32.mrf.mxu0  ;;  %1098 = vmatpush.msrb.mxu2 %v1002_v42  ;;  %1248 = vmatpush.msra.mxu1 %v955_v44  ;;  %v932_v42 = vld [vmem:[#allocation4 + $0xf8] sm:$0xff]  ;;  %v1043_v44 = vld [vmem:[#allocation6 + $0x230] sm:$0xff] }
 0x13f   : > { %v730_v45 = vadd.f32 %v729_v46, %v587_v48  ;;  %v1020_v46 = vld [vmem:[#allocation6 + $0x178] sm:$0xff]  ;;  %v954_v48 = vld [vmem:[#allocation4 + $0x1a8] sm:$0xff] }
 0x140   : > { %1116 = vmatpush.msrb.mxu3 %v1020_v46  ;;  %1099 = vmatpush.msrb.mxu2 %v1001_v47  ;;  %v912_v46 = vld [vmem:[#allocation4 + $0x58] sm:$0xff]  ;;  %v931_v47 = vld [vmem:[#allocation4 + $0xf0] sm:$0xff] }
 0x141   : > { %v750_v55 = vadd.f32 %v749_v54, %v730_v45  ;;  %1249 = vmatpush.msra.mxu1 %v954_v48  ;;  %v952_v45 = vld [vmem:[#allocation4 + $0x198] sm:$0xff]  ;;  %v951_v54 = vld [vmem:[#allocation4 + $0x190] sm:$0xff] }
 0x142   : > { %v709_v51 = vpop.f32.mrf.mxu3  ;;  %1117 = vmatpush.msrb.mxu3 %v1019_v5  ;;  %v910_v5 = vld [vmem:[#allocation4 + $0x48] sm:$0xff] }
 0x143   : > { %v710_v52 = vadd.f32 %v709_v51, %v690_v49  ;;  %v843_v58 = vadd.f32 %v835_v57, %v750_v55  ;;  %v953_v49 = vld [vmem:[#allocation4 + $0x1a0] sm:$0xff]  ;;  %v1000_v51 = vld [vmem:[#allocation6 + $0xd8] sm:$0xff]  ;;  %v1018_v55 = vld [vmem:[#allocation6 + $0x168] sm:$0xff] }
 0x144   : > { %1250 = vmatpush.msra.mxu1 %v953_v49  ;;  %1100 = vmatpush.msrb.mxu2 %v1000_v51  ;;  %v998_v57 = vld [vmem:[#allocation6 + $0xc8] sm:$0xff] }
 0x145   : > { %v842_v53 = vadd.f32 %v834_v50, %v710_v52  ;;  %v847_v59 = vmax.f32 %v843_v58, 0.0  ;;  %v987_v50 = vld [vmem:[#allocation6 + $0x70] sm:$0xff]  ;;  %v986_v52 = vld [vmem:[#allocation6 + $0x68] sm:$0xff]  ;;  %1118 = vmatpush.msrb.mxu3 %v1018_v55  ;;  %v928_v55 = vld [vmem:[#allocation4 + $0xd8] sm:$0xff] }
 0x146   : > { %v809_v4 = vpop.f32.mrf.mxu1  ;;  %1077 = vmatpush.msrb.mxu0 %v987_v50  ;;  %1251 = vmatpush.msra.mxu1 %v952_v45  ;;  %v950_v58 = vld [vmem:[#allocation4 + $0x188] sm:$0xff]  ;;  %v911_v50 = vld [vmem:[#allocation4 + $0x50] sm:$0xff]  ;;  %v1041_v45 = vld [vmem:[#allocation6 + $0x220] sm:$0xff] }
 0x147   : > { %v846_v56 = vmax.f32 %v842_v53, 0.0  ;;  %v810_v10 = vadd.f32 %v809_v4, %v667_v7  ;;  %v999_v53 = vld [vmem:[#allocation6 + $0xd0] sm:$0xff]  ;;  %v981_v7 = vld [vmem:[#allocation6 + $0x40] sm:$0xff]  ;;  %v1042_v49 = vld [vmem:[#allocation6 + $0x228] sm:$0xff] }
 0x148   : > { %1078 = vmatpush.msrb.mxu0 %v986_v52  ;;  %1101 = vmatpush.msrb.mxu2 %v999_v53  ;;  %v995_v4 = vld [vmem:[#allocation6 + $0xb0] sm:$0xff]  ;;  %v930_v51 = vld [vmem:[#allocation4 + $0xe8] sm:$0xff]  ;;  %v929_v52 = vld [vmem:[#allocation4 + $0xe0] sm:$0xff] }
 0x149   : > { %873 = vrot.lane.b32.xlu2 %v846_v56, %s1504_s11  ;;  %v830_v17 = vadd.f32 %v829_v16, %v810_v10  ;;  %v985_v56 = vld [vmem:[#allocation6 + $0x60] sm:$0xff]  ;;  %1252 = vmatpush.msra.mxu1 %v951_v54  ;;  %v1011_v16 = vld [vmem:[#allocation6 + $0x130] sm:$0xff]  ;;  %v1040_v53 = vld [vmem:[#allocation6 + $0x218] sm:$0xff] }
 0x14a   : > { %1079 = vmatpush.msrb.mxu0 %v985_v56  ;;  %1102 = vmatpush.msrb.mxu2 %v998_v57  ;;  %v1013_v10 = vld [vmem:[#allocation6 + $0x140] sm:$0xff]  ;;  %v1039_v56 = vld [vmem:[#allocation6 + $0x210] sm:$0xff]  ;;  %v908_v57 = vld [vmem:[#allocation4 + $0x38] sm:$0xff] }
 0x14b   : > { %v845_v23 = vadd.f32 %v837_v18, %v830_v17  ;;  %1253 = vmatpush.msra.mxu1 %v950_v58  ;;  %v978_v17 = vld [vmem:[#allocation6 + $0x28] sm:$0xff]  ;;  %v991_v18 = vld [vmem:[#allocation6 + $0x90] sm:$0xff]  ;;  %v909_v54 = vld [vmem:[#allocation4 + $0x40] sm:$0xff] }
 0x14c   : > { %1080 = vmatpush.msrb.mxu0 %v984_v60  ;;  %1103 = vmatpush.msrb.mxu2 %v997_v61  ;;  %v927_v58 = vld [vmem:[#allocation4 + $0xd0] sm:$0xff]  ;;  %v926_v61 = vld [vmem:[#allocation4 + $0xc8] sm:$0xff] }
 0x14d   : > { %v849_v27 = vmax.f32 %v845_v23, 0.0  ;;  %1254 = vmatpush.msra.mxu1 %v949_v62  ;;  %v1009_v23 = vld [vmem:[#allocation6 + $0x120] sm:$0xff]  ;;  %v907_v60 = vld [vmem:[#allocation4 + $0x30] sm:$0xff] }
 0x14e   : > { %1081 = vmatpush.msrb.mxu0 %v983_v0  ;;  %1104 = vmatpush.msrb.mxu2 %v996_v1  ;;  %v1037_v62 = vld [vmem:[#allocation6 + $0x200] sm:$0xff] }
 0x14f   : > { %v853_v31 = vrot.slane %v849_v27, 7  ;;  %v1008_v27 = vld [vmem:[#allocation6 + $0x118] sm:$0xff]  ;;  %v925_v0 = vld [vmem:[#allocation4 + $0xc0] sm:$0xff] }
 0x150   : > { %1082 = vmatpush.msrb.mxu0 %v982_v3  ;;  %1105 = vmatpush.msrb.mxu2 %v995_v4  ;;  %v905_v1 = vld [vmem:[#allocation4 + $0x20] sm:$0xff]  ;;  %v904_v3 = vld [vmem:[#allocation4 + $0x18] sm:$0xff]  ;;  %v923_v4 = vld [vmem:[#allocation4 + $0xb0] sm:$0xff] }
 0x151   : > { %875 = vrot.lane.b32.xlu2 %v847_v59, %s1504_s11  ;;  %v1017_v59 = vld [vmem:[#allocation6 + $0x160] sm:$0xff] }
 0x152   : > { %1119 = vmatpush.msrb.mxu3 %v1017_v59  ;;  %1083 = vmatpush.msrb.mxu0 %v981_v7  ;;  %v1038_v59 = vld [vmem:[#allocation6 + $0x208] sm:$0xff] }
 0x153   : > { %1106 = vmatpush.msrb.mxu2 %v994_v8  ;;  %v922_v7 = vld [vmem:[#allocation4 + $0xa8] sm:$0xff] }
 0x154   : > { %v902_v8 = vld [vmem:[#allocation4 + $0x8] sm:$0xff] }
 0x15e   : > { %v769_v9 = vpop.f32.mrf.mxu3 }
 0x15f   : > { %v770_v11 = vadd.f32 %v769_v9, %v627_v6  ;;  %v1014_v6 = vld [vmem:[#allocation6 + $0x148] sm:$0xff] }
 0x161   : > { %v790_v14 = vadd.f32 %v789_v63, %v770_v11  ;;  %v1016_v63 = vld [vmem:[#allocation6 + $0x158] sm:$0xff] }
 0x162   : > { %1120 = vmatpush.msrb.mxu3 %v1016_v63  ;;  %v980_v11 = vld [vmem:[#allocation6 + $0x38] sm:$0xff]  ;;  %v906_v63 = vld [vmem:[#allocation4 + $0x28] sm:$0xff] }
 0x163   : > { %v844_v19 = vadd.f32 %v836_v12, %v790_v14  ;;  %v993_v12 = vld [vmem:[#allocation6 + $0xa0] sm:$0xff]  ;;  %v979_v14 = vld [vmem:[#allocation6 + $0x30] sm:$0xff]  ;;  %1084 = vmatpush.msrb.mxu0 %v980_v11 }
 0x164   : > { %1121 = vmatpush.msrb.mxu3 %v1015_v2  ;;  %1107 = vmatpush.msrb.mxu2 %v993_v12  ;;  %v924_v2 = vld [vmem:[#allocation4 + $0xb8] sm:$0xff]  ;;  %v901_v11 = vld [vmem:[#allocation4] sm:$0xff] }
 0x165   : > { %v848_v21 = vmax.f32 %v844_v19, 0.0  ;;  %1085 = vmatpush.msrb.mxu0 %v979_v14  ;;  %v1010_v19 = vld [vmem:[#allocation6 + $0x128] sm:$0xff]  ;;  %v920_v12 = vld [vmem:[#allocation4 + $0x98] sm:$0xff] }
 0x166   : > { %1122 = vmatpush.msrb.mxu3 %v1014_v6  ;;  %1108 = vmatpush.msrb.mxu2 %v992_v15  ;;  %v903_v6 = vld [vmem:[#allocation4 + $0x10] sm:$0xff]  ;;  %v918_v14 = vld [vmem:[#allocation4 + $0x88] sm:$0xff]  ;;  %v917_v15 = vld [vmem:[#allocation4 + $0x80] sm:$0xff] }
 0x167   : > { %v852_v24 = vrot.slane %v848_v21, 7  ;;  %v990_v21 = vld [vmem:[#allocation6 + $0x88] sm:$0xff]  ;;  %1086 = vmatpush.msrb.mxu0 %v978_v17 }
 0x168   : > { %1123 = vmatpush.msrb.mxu3 %v1013_v10  ;;  %1109 = vmatpush.msrb.mxu2 %v991_v18  ;;  %v921_v10 = vld [vmem:[#allocation4 + $0xa0] sm:$0xff] }
 0x169   : > { %854 = vrot.lane.b32.xlu1 %v852_v24, %s1505_s12  ;;  %1087 = vmatpush.msrb.mxu0 %v977_v20 }
 0x16a   : > { %1124 = vmatpush.msrb.mxu3 %v1012_v13  ;;  %1110 = vmatpush.msrb.mxu2 %v990_v21  ;;  %v919_v13 = vld [vmem:[#allocation4 + $0x90] sm:$0xff] }
 0x16b   : > { %1088 = vmatpush.msrb.mxu0 %v976_v25  ;;  %v947_v25 = vld [vmem:[#allocation4 + $0x170] sm:$0xff] }
 0x16c   : > { %1125 = vmatpush.msrb.mxu3 %v1011_v16  ;;  %1111 = vmatpush.msrb.mxu2 %v989_v26 }
 0x16d   : > { %1089 = vmatpush.msrb.mxu0 %v975_v29 }
 0x16e   : > { %1126 = vmatpush.msrb.mxu3 %v1010_v19  ;;  %1179 = vmatpush.msra.mxu2 %v916_v28  ;;  %v946_v28 = vld [vmem:[#allocation4 + $0x168] sm:$0xff] }
 0x16f   : > { %1090 = vmatpush.msrb.mxu0 %v974_v33 }
 0x170   : > { %1127 = vmatpush.msrb.mxu3 %v1009_v23  ;;  %v948_v23 = vld [vmem:[#allocation4 + $0x178] sm:$0xff] }
 0x171   : > { %856 = vrot.lane.b32.xlu1 %v853_v31, %s1505_s12  ;;  %v915_v31 = vld [vmem:[#allocation4 + $0x70] sm:$0xff]  ;;  %1091 = vmatpush.msrb.mxu0 %v973_v36 }
 0x172   : > { %1128 = vmatpush.msrb.mxu3 %v1008_v27  ;;  %1180 = vmatpush.msra.mxu2 %v915_v31  ;;  %v900_v27 = vld [vmem:[#allocation3 + $0x48] sm:$0x1]  ;;  %v945_v31 = vld [vmem:[#allocation4 + $0x160] sm:$0xff] }
 0x173   : > { %1164 = vmatpush.msra.mxu0 %v1044_v39 }
 0x174   : > { %1129 = vmatpush.msrb.mxu3 %v1007_v30  ;;  %1181 = vmatpush.msra.mxu2 %v914_v35  ;;  %v1068_v30 = vrot.slane %v900_v27, 1  ;;  %v944_v35 = vld [vmem:[#allocation4 + $0x158] sm:$0xff] }
 0x175   : > { %1165 = vmatpush.msra.mxu0 %v1043_v44  ;;  %v971_v44 = vld [vmem:[#allocation4 + $0x230] sm:$0xff] }
 0x176   : > { %1130 = vmatpush.msrb.mxu3 %v1006_v34  ;;  %1182 = vmatpush.msra.mxu2 %v913_v41 }
 0x177   : > { %1166 = vmatpush.msra.mxu0 %v1042_v49  ;;  %v941_v49 = vld [vmem:[#allocation4 + $0x140] sm:$0xff] }
 0x178   : > { %1131 = vmatpush.msrb.mxu3 %v1005_v38  ;;  %1183 = vmatpush.msra.mxu2 %v912_v46 }
 0x179   : > { %1167 = vmatpush.msra.mxu0 %v1041_v45  ;;  %v968_v45 = vld [vmem:[#allocation4 + $0x218] sm:$0xff] }
 0x17a   : > { %1199 = vmatpush.msra.mxu3 %v932_v42  ;;  %1184 = vmatpush.msra.mxu2 %v911_v50  ;;  %v969_v50 = vld [vmem:[#allocation4 + $0x220] sm:$0xff] }
 0x17b   : > { %1168 = vmatpush.msra.mxu0 %v1040_v53  ;;  %v967_v53 = vld [vmem:[#allocation4 + $0x210] sm:$0xff] }
 0x17c   : > { %1200 = vmatpush.msra.mxu3 %v931_v47  ;;  %1185 = vmatpush.msra.mxu2 %v910_v5  ;;  %v942_v47 = vld [vmem:[#allocation4 + $0x148] sm:$0xff] }
 0x17d   : > { %1169 = vmatpush.msra.mxu0 %v1039_v56  ;;  %v966_v56 = vld [vmem:[#allocation4 + $0x208] sm:$0xff] }
 0x17e   : > { %1201 = vmatpush.msra.mxu3 %v930_v51  ;;  %1186 = vmatpush.msra.mxu2 %v909_v54  ;;  %v940_v51 = vld [vmem:[#allocation4 + $0x138] sm:$0xff] }
 0x17f   : > { %1170 = vmatpush.msra.mxu0 %v1038_v59  ;;  %v936_v59 = vld [vmem:[#allocation4 + $0x118] sm:$0xff] }
 0x180   : > { %1202 = vmatpush.msra.mxu3 %v929_v52  ;;  %1187 = vmatpush.msra.mxu2 %v908_v57  ;;  %v939_v52 = vld [vmem:[#allocation4 + $0x130] sm:$0xff]  ;;  %v937_v57 = vld [vmem:[#allocation4 + $0x120] sm:$0xff] }
 0x181   : > { %1171 = vmatpush.msra.mxu0 %v1037_v62  ;;  %v934_v62 = vld [vmem:[#allocation4 + $0x108] sm:$0xff] }
 0x182   : > { %1203 = vmatpush.msra.mxu3 %v928_v55  ;;  %1188 = vmatpush.msra.mxu2 %v907_v60  ;;  %v938_v55 = vld [vmem:[#allocation4 + $0x128] sm:$0xff] }
 0x184   : > { %1204 = vmatpush.msra.mxu3 %v927_v58  ;;  %1189 = vmatpush.msra.mxu2 %v906_v63  ;;  %v965_v58 = vld [vmem:[#allocation4 + $0x200] sm:$0xff] }
 0x185   : > { %v933_v63 = vld [vmem:[#allocation4 + $0x100] sm:$0xff] }
 0x186   : > { %1205 = vmatpush.msra.mxu3 %v926_v61  ;;  %1190 = vmatpush.msra.mxu2 %v905_v1  ;;  %v935_v61 = vld [vmem:[#allocation4 + $0x110] sm:$0xff] }
 0x188   : > { %1206 = vmatpush.msra.mxu3 %v925_v0  ;;  %1191 = vmatpush.msra.mxu2 %v904_v3 }
 0x18a   : > { %1207 = vmatpush.msra.mxu3 %v924_v2  ;;  %1192 = vmatpush.msra.mxu2 %v903_v6 }
 0x18c   : > { %1208 = vmatpush.msra.mxu3 %v923_v4  ;;  %1193 = vmatpush.msra.mxu2 %v902_v8 }
 0x18e   : > { %1209 = vmatpush.msra.mxu3 %v922_v7  ;;  %1194 = vmatpush.msra.mxu2 %v901_v11 }
 0x190   : > { %1210 = vmatpush.msra.mxu3 %v921_v10 }
 0x192   : > { %1211 = vmatpush.msra.mxu3 %v920_v12 }
 0x194   : > { %1212 = vmatpush.msra.mxu3 %v919_v13 }
 0x196   : > { %1213 = vmatpush.msra.mxu3 %v918_v14 }
 0x198   : > { %1214 = vmatpush.msra.mxu3 %v917_v15 }
 0x1a3   : > { %v2060_v9 = vpop.permute.xlu2 %873 }
 0x1ab   : > { %v876_v22 = vpop.permute.xlu2 %875 }
 0x1ac   : > { %v2063_v24 = vsel %vm877_vm9, %v2060_v9, %v876_v22  ;;  %885 = vst.msk [vmem:[#allocation3 + $0x20] sm:$0xff] %vm877_vm9, %v876_v22 }
 0x1ad   : > { %884 = vst [vmem:[#allocation3 + $0x18] sm:$0xff] %v2063_v24 }
 0x1b3   : > { %v895_v26 = vld [vmem:[#allocation3 + $0x20] sm:$0xfe] }
 0x1b4   : > { %v894_v40 = vld [vmem:[#allocation3 + $0x18] sm:$0xfe]  ;;  %v1067_v29 = vrot.slane %v895_v26, 1  ;;  %v890_v60 = vld [vmem:[#allocation3 + $0x20] sm:$0xff] }
 0x1b5   : > { %v1064_v43 = vrot.slane %v894_v40, 1  ;;  %v972_v40 = vld [vmem:[#allocation4 + $0x238] sm:$0xff] }
 0x1b7   : > { %v1066_v48 = vsel %vm499_vm6, %v1064_v43, %v1065_v37  ;;  %v943_v43 = vld [vmem:[#allocation4 + $0x150] sm:$0xff] }
 0x1b8   : > { %1152 = vmatmul.f32.vlgmr.msrb.gmra.mxu1 %v1066_v48  ;;  %v970_v48 = vld [vmem:[#allocation4 + $0x228] sm:$0xff] }
 0x1c0   : > { %1255 = vmatmul.f32.vlgmr.msra.gmra.mxu1 %v2063_v24 }
 0x1db   : > { %v855_v16 = vpop.permute.xlu1 %854 }
 0x1dc   : > { %863 = vst.msk [vmem:[#allocation3] sm:$0xfe] %vm862_vm10, %v855_v16 }
 0x1dd   : > { %868 = vst.msk [vmem:[#allocation3 + $0x28] sm:$0x1] %vm867_vm11, %v855_v16 }
 0x1e3   : > { %v857_v17 = vpop.permute.xlu1 %856  ;;  %v891_v18 = vld [vmem:[#allocation3] sm:$0xfe] }
 0x1e4   : > { %v858_v19 = vsel %vm309_vm0, %v855_v16, %v857_v17  ;;  %866 = vst.msk [vmem:[#allocation3 + $0x10] sm:$0xfe] %vm865_vm12, %v857_v17  ;;  %v896_v20 = vld [vmem:[#allocation3 + $0x28] sm:$0x1]  ;;  %v1055_v21 = vrot.slane %v891_v18, 1  ;;  %v886_v5 = vld [vmem:[#allocation3] sm:$0xff] }
 0x1e5   : > { %864 = vst [vmem:[#allocation3 + $0x8] sm:$0xfe] %v858_v19  ;;  %v1056_v22 = vrot.slane %v896_v20, 1  ;;  %v1420_v20 = vld [vmem:[%s2094_s6] ss:$0 sm:$0xff] }
 0x1e6   : > { %869 = vst [vmem:[#allocation3 + $0x30] sm:$0x1] %v858_v19 }
 0x1e7   : > { %870 = vst.msk [vmem:[#allocation3 + $0x38] sm:$0x1] %vm312_vm1, %v857_v17  ;;  %v1057_v24 = vsel %vm499_vm6, %v1055_v21, %v1056_v22 }
 0x1e8   : > { %883 = vst.msk [vmem:[#allocation3 + $0x10] sm:$0xff] %vm882_vm13, %v2060_v9  ;;  %1092 = vmatmul.f32.vlgmr.msrb.gmra.mxu0 %v1057_v24  ;;  %v1069_v9 = vsel %vm499_vm6, %v1067_v29, %v1068_v30 }
 0x1e9   : > { %1219 = vmatpush.msrb.mxu0 %v948_v23 }
 0x1eb   : > { %1220 = vmatpush.msrb.mxu0 %v947_v25 }
 0x1ec   : > { %v892_v32 = vld [vmem:[#allocation3 + $0x8] sm:$0xfe] }
 0x1ed   : > { %1221 = vmatpush.msrb.mxu0 %v946_v28  ;;  %v897_v33 = vld [vmem:[#allocation3 + $0x30] sm:$0x1]  ;;  %v1058_v34 = vrot.slane %v892_v32, 1  ;;  %v887_v54 = vld [vmem:[#allocation3 + $0x8] sm:$0xff] }
 0x1ee   : > { %v1059_v36 = vrot.slane %v897_v33, 1  ;;  %v898_v37 = vld [vmem:[#allocation3 + $0x38] sm:$0x1] }
 0x1ef   : > { %1222 = vmatpush.msrb.mxu0 %v945_v31  ;;  %v893_v38 = vld [vmem:[#allocation3 + $0x10] sm:$0xfe]  ;;  %v1062_v39 = vrot.slane %v898_v37, 1 }
 0x1f0   : > { %1380 = vmatmul.msk.f32.vlgmr.msra.gmra.mxu0 %vm318_vm7, %v1069_v9  ;;  %v1060_v41 = vsel %vm499_vm6, %v1058_v34, %v1059_v36  ;;  %v1061_v42 = vrot.slane %v893_v38, 1  ;;  %v888_v0 = vld [vmem:[#allocation3 + $0x10] sm:$0xff] }
 0x1f1   : > { %1223 = vmatpush.msrb.mxu0 %v944_v35  ;;  %1112 = vmatmul.f32.vlgmr.msrb.gmra.mxu2 %v1060_v41 }
 0x1f2   : > { %v1063_v46 = vsel %vm499_vm6, %v1061_v42, %v1062_v39  ;;  %1267 = vmatpush.msrb.mxu2 %v972_v40 }
 0x1f3   : > { %1132 = vmatmul.f32.vlgmr.msrb.gmra.mxu3 %v1063_v46  ;;  %1224 = vmatpush.msrb.mxu0 %v943_v43 }
 0x1f4   : > { %1268 = vmatpush.msrb.mxu2 %v971_v44 }
 0x1f5   : > { %1225 = vmatpush.msrb.mxu0 %v942_v47 }
 0x1f6   : > { %1269 = vmatpush.msrb.mxu2 %v970_v48 }
 0x1f7   : > { %1226 = vmatpush.msrb.mxu0 %v941_v49 }
 0x1f8   : > { %1270 = vmatpush.msrb.mxu2 %v969_v50 }
 0x1f9   : > { %1227 = vmatpush.msrb.mxu0 %v940_v51  ;;  %1195 = vmatmul.f32.vlgmr.msra.gmra.mxu2 %v886_v5 }
 0x1fa   : > { %1271 = vmatpush.msrb.mxu2 %v968_v45 }
 0x1fb   : > { %1215 = vmatmul.f32.vlgmr.msra.gmra.mxu3 %v887_v54  ;;  %1228 = vmatpush.msrb.mxu0 %v939_v52 }
 0x1fc   : > { %1272 = vmatpush.msrb.mxu2 %v967_v53 }
 0x1fd   : > { %1229 = vmatpush.msrb.mxu0 %v938_v55 }
 0x1fe   : > { %1273 = vmatpush.msrb.mxu2 %v966_v56 }
 0x1ff   : > { %1230 = vmatpush.msrb.mxu0 %v937_v57 }
 0x200   : > { %1274 = vmatpush.msrb.mxu2 %v965_v58 }
 0x201   : > { %1231 = vmatpush.msrb.mxu0 %v936_v59  ;;  %1381 = vmatmul.msk.f32.vlgmr.msrb.gmra.mxu2 %vm318_vm7, %v890_v60 }
 0x203   : > { %1232 = vmatpush.msrb.mxu0 %v935_v61 }
 0x205   : > { %1233 = vmatpush.msrb.mxu0 %v934_v62 }
 0x207   : > { %1234 = vmatpush.msrb.mxu0 %v933_v63 }
 0x208   : > { %1235 = vmatmul.f32.vlgmr.msrb.gmra.mxu0 %v888_v0 }
 0x235   : > { %v1153_v7 = vpop.f32.mrf.mxu1 }
 0x23d   : > { %v1256_v18 = vpop.f32.mrf.mxu1 }
 0x265   : > { %v1093_v1 = vpop.f32.mrf.mxu0 }
 0x26d   : > { %v1173_v10 = vpop.f32.mrf.mxu0 }
 0x274   : > { %v1113_v2 = vpop.f32.mrf.mxu2 }
 0x275   : > { %v1114_v3 = vadd.f32 %v1113_v2, %v1093_v1 }
 0x276   : > { %v1133_v4 = vpop.f32.mrf.mxu3 }
 0x277   : > { %v1134_v6 = vadd.f32 %v1133_v4, %v1114_v3 }
 0x279   : > { %v1154_v8 = vadd.f32 %v1153_v7, %v1134_v6 }
 0x27b   : > { %v1174_v11 = vadd.f32 %v1173_v10, %v1154_v8 }
 0x27c   : > { %v1196_v12 = vpop.f32.mrf.mxu2 }
 0x27d   : > { %v1197_v13 = vadd.f32 %v1196_v12, %v1174_v11 }
 0x27e   : > { %v1216_v14 = vpop.f32.mrf.mxu3 }
 0x27f   : > { %v1217_v15 = vadd.f32 %v1216_v14, %v1197_v13 }
 0x284   : > { %v1276_v21 = vpop.f32.mrf.mxu2 }
 0x285   : > { %v1236_v16 = vpop.f32.mrf.mxu0 }
 0x286   : > { %v1237_v17 = vadd.f32 %v1236_v16, %v1217_v15 }
 0x288   : > { %v1257_v19 = vadd.f32 %v1256_v18, %v1237_v17 }
 0x28a   : > { %v1277_v22 = vadd.f32 %v1276_v21, %v1257_v19 }
 0x28c   : > { %v1283_v23 = vadd.f32 %v1420_v20, %v1277_v22 }
 0x28e   : > { %v1284_v24 = vmax.f32 %v1283_v23, 0.0 }
 0x290   : > { %1285 = vst [vmem:[%s307_s18] sm:$0xff] %v1284_v24 }
 0x291 PF: > { %s19_s24 = sadd.s32 1, %s1495_s24  }
 0x292   : > { %p16_p7 = scmp.ge.s32.totalorder %s19_s24, 4  }
 0x294   :  { %18 = sbr.rel (!%p16_p7) target bundleno = 2 (0x2), region = 87 }
 0x299   :  { %1305 = vsyncpa [#allocation5], 1 }
 0x29a   :  { %1307 = vsyncpa [#allocation5 + $0x1], 1 }
 0x29b   :  { %1308 = vsyncpa [#allocation7], 1 }

</bundles_post_ra>
